<compile_context>
chip_gen: v5e
topology: v5e:2x2
jax: 0.10.0
libtpu: 0.0.40
codegen_flags: <defaults>
</compile_context>

<pallas_src>
import jax
import jax.numpy as jnp
from jax.experimental import pallas as pl
from jax.experimental.pallas import tpu as pltpu

# ------------------------- configuration (small shapes) -------------------------
B = 2                 # batch per branch
H = W = 16            # spatial
CIN = 3               # RGB input channels
NUM_FTRS = 64         # stand-in for densenet201's 1920 classifier in_features
EMBED = 128           # branch classifier output (Linear(num_ftrs, 128))
CLASSES = 2           # self.cls -> Linear(128, 2)
SUBS = 4              # Sub_Adaptor classes
NEG_SLOPE = 0.01      # nn.LeakyReLU default negative_slope
KSIZE = 3
KC = KSIZE * KSIZE * CIN       # 27 (im2col depth per branch)
KCP = 32                       # per-branch depth padded to 32 lanes
KF = 128                       # fused conv K: 3*32 = 96, padded to one full MXU pass
NPIX = B * H * W               # 512 rows in the fused conv matmul
NFEAT = 3 * NUM_FTRS           # 192 fused conv output lanes
NEMB = 3 * EMBED               # 384 fused embedding lanes
HEAD_IN = NEMB + EMBED         # 512 fused head contraction
OUT_LANES = 128                # lane-dense combined output slab
PRED_OFF = 0                   # preds at lanes [0, CLASSES)
DD_OFF = 64                    # dd_out at lanes [64, 64+SUBS)


# ------------------------------- Pallas kernel ---------------------------------
def fused_kernel(patch_ref, conv_w_ref, pool_ref, cls_w_ref, cls_b_ref,
                 w_head_ref, b_head_ref, out_ref):
    """Three branch nets + Sub_Adaptor + cls head: 4 MXU matmuls, all in VMEM."""
    # (1) all three branch 3x3 convs in ONE block-diagonal matmul: [512,128]x[128,192]
    feat = jnp.dot(patch_ref[...], conv_w_ref[...],
                   preferred_element_type=jnp.float32)            # [NPIX, NFEAT] f32
    feat = jnp.maximum(feat, 0.0)                                  # ReLU (f32 VPU, lane-dense)

    # (2) global-avg-pool for all branches on the MXU (bf16 operands, f32 accumulation)
    pooled = jnp.dot(pool_ref[...], feat.astype(jnp.bfloat16),
                     preferred_element_type=jnp.float32)           # [B, NFEAT] f32

    # (3) all three branch classifiers in ONE block-diagonal matmul -> emb slab [B, 384]
    emb_all = jnp.dot(pooled.astype(jnp.bfloat16), cls_w_ref[...],
                      preferred_element_type=jnp.float32) + cls_b_ref[...]
    e = [emb_all[:, br * EMBED:(br + 1) * EMBED] for br in range(3)]  # 128-aligned lane blocks

    # (4) cls head input: LeakyReLU(max over the three branch lane-blocks)
    m = jnp.maximum(jnp.maximum(e[0], e[1]), e[2])                 # [B, EMBED]
    m = jnp.where(m >= 0, m, NEG_SLOPE * m)

    # (5) dd_in == torch.stack(embs).view(-1, 3*EMBED): rows 3r..3r+2 of the branch-major
    #     stack become the lane blocks of dd row r.  This cross-row regroup is kept as
    #     explicit slices + concats (Mosaic reshape across the lane dim is not guaranteed);
    #     it is a handful of single-vreg ops on a [3B, 128] slab.
    flat = jnp.concatenate(e, axis=0)                              # [3B, EMBED], stack order
    dd_in = jnp.concatenate(
        [jnp.concatenate([flat[3 * r + j:3 * r + j + 1, :] for j in range(3)], axis=1)
         for r in range(B)], axis=0)                               # [B, 3*EMBED]

    # (6) both heads fused into ONE matmul + one lane-dense store:
    #     out[:, PRED_OFF:PRED_OFF+2] = cls(m),  out[:, DD_OFF:DD_OFF+4] = Sub_Adaptor(dd_in)
    head_in = jnp.concatenate([dd_in, m], axis=1).astype(jnp.bfloat16)   # [B, 512]
    out_ref[...] = (jnp.dot(head_in, w_head_ref[...],
                            preferred_element_type=jnp.float32) + b_head_ref[...])


# ------------------------------- im2col (wrapper glue) --------------------------
def _im2col_branches(x_nchw_all):
    """[3, B, CIN, H, W] -> per-branch padded im2col patches [3, NPIX, KCP] bf16."""
    x = jnp.transpose(x_nchw_all, (0, 1, 3, 4, 2))                 # NHWC
    xp = jnp.pad(x, ((0, 0), (0, 0), (1, 1), (1, 1), (0, 0)))      # same-padding
    cols = [xp[:, :, ky:ky + H, kx:kx + W, :]
            for ky in range(KSIZE) for kx in range(KSIZE)]
    p = jnp.concatenate(cols, axis=-1).reshape(3, NPIX, KC)        # [3, 512, 27]
    p = jnp.pad(p, ((0, 0), (0, 0), (0, KCP - KC)))                # 27 -> 32 lanes
    return p.astype(jnp.bfloat16)


def _im2col_fused(x_nchw_all):
    """Fused patch slab [NPIX, KF] bf16: branch br in lanes br*32:(br+1)*32, rest zero."""
    p = _im2col_branches(x_nchw_all)                               # [3, 512, 32]
    p = jnp.transpose(p, (1, 0, 2)).reshape(NPIX, 3 * KCP)         # [512, 96]
    return jnp.pad(p, ((0, 0), (0, KF - 3 * KCP)))                 # [512, 128]


# ------------------------------- JAX wrapper -------------------------------------
@jax.jit
def multibranch_forward(inp, params):
    patches = _im2col_fused(inp)                                   # [512, 128] bf16

    out = pl.pallas_call(
        fused_kernel,
        out_shape=jax.ShapeDtypeStruct((B, OUT_LANES), jnp.float32),
        grid=(1,),
        in_specs=[
            pl.BlockSpec((NPIX, KF), lambda i: (0, 0)),            # fused patches
            pl.BlockSpec((KF, NFEAT), lambda i: (0, 0)),           # block-diag conv w
            pl.BlockSpec((B, NPIX), lambda i: (0, 0)),             # pool selector (bf16)
            pl.BlockSpec((NFEAT, NEMB), lambda i: (0, 0)),         # block-diag cls w
            pl.BlockSpec((1, NEMB), lambda i: (0, 0)),             # cls biases
            pl.BlockSpec((HEAD_IN, OUT_LANES), lambda i: (0, 0)),  # combined head w
            pl.BlockSpec((1, OUT_LANES), lambda i: (0, 0)),        # combined head b
        ],
        out_specs=pl.BlockSpec((B, OUT_LANES), lambda i: (0, 0)),
        compiler_params=pltpu.CompilerParams(dimension_semantics=("arbitrary",)),
    )(patches, params["conv_w_fused"], params["pool"], params["cls_w_fused"],
      params["cls_b_fused"], params["w_head"], params["b_head"])

    preds = out[:, PRED_OFF:PRED_OFF + CLASSES]
    dd_out = out[:, DD_OFF:DD_OFF + SUBS]
    return preds, dd_out


# ---------------------------- pure-JAX reference ----------------------------------
def reference_forward(inp, params):
    """Mirrors the PyTorch graph per branch (same bf16-operand / f32-accumulate policy)."""
    patches = _im2col_branches(inp)                                # [3, 512, 32] bf16
    embs = []
    for br in range(3):
        w = jnp.pad(params["conv_w"][br], ((0, KCP - KC), (0, 0))).astype(jnp.bfloat16)
        conv = jnp.dot(patches[br], w, preferred_element_type=jnp.float32)
        feat = jnp.maximum(conv, 0.0)
        pooled = jnp.dot(params["pool"], feat.astype(jnp.bfloat16),
                         preferred_element_type=jnp.float32)       # [B, 64]
        emb = jnp.dot(pooled.astype(jnp.bfloat16),
                      params["cls_w"][br].astype(jnp.bfloat16),
                      preferred_element_type=jnp.float32) + params["cls_b"][br]
        embs.append(emb)
    concat = jnp.stack(embs)                                       # [3, B, 128]
    dd_in = concat.reshape(-1, NEMB)                               # torch .view(-1, 384)
    dd_out = jnp.dot(dd_in.astype(jnp.bfloat16), params["w_sub"].astype(jnp.bfloat16),
                     preferred_element_type=jnp.float32) + params["b_sub"]
    m = jnp.max(concat, axis=0)
    m = jnp.where(m >= 0, m, NEG_SLOPE * m)
    preds = jnp.dot(m.astype(jnp.bfloat16), params["w_cls2"].astype(jnp.bfloat16),
                    preferred_element_type=jnp.float32) + params["b_cls2"]
    return preds, dd_out


# -------------------------- deterministic parameters ------------------------------
def init_params():
    keys = jax.random.split(jax.random.PRNGKey(42), 7)
    s = 0.05
    f32 = jnp.float32
    conv_w = s * jax.random.normal(keys[0], (3, KC, NUM_FTRS), f32)     # 3 branch convs
    cls_w = s * jax.random.normal(keys[1], (3, NUM_FTRS, EMBED), f32)   # 3 branch Linear(num_ftrs,128)
    cls_b = s * jax.random.normal(keys[2], (3, EMBED), f32)
    w_sub = s * jax.random.normal(keys[3], (NEMB, SUBS), f32)           # Sub_Adaptor Linear(384, subs)
    b_sub = s * jax.random.normal(keys[4], (SUBS,), f32)
    w_cls2 = s * jax.random.normal(keys[5], (EMBED, CLASSES), f32)      # cls Linear(128, 2)
    b_cls2 = s * jax.random.normal(keys[6], (CLASSES,), f32)

    # global-avg-pool selector (block-diagonal over batch); 1/256 is exact in bf16
    pool = (jnp.repeat(jnp.eye(B, dtype=f32), H * W, axis=1) / float(H * W)).astype(jnp.bfloat16)

    # block-diagonal fused weights (built in f32 so off-diagonal blocks are exact zeros)
    conv_w_fused = jnp.zeros((KF, NFEAT), f32)
    cls_w_fused = jnp.zeros((NFEAT, NEMB), f32)
    for br in range(3):
        conv_w_fused = conv_w_fused.at[br * KCP:br * KCP + KC,
                                       br * NUM_FTRS:(br + 1) * NUM_FTRS].set(conv_w[br])
        cls_w_fused = cls_w_fused.at[br * NUM_FTRS:(br + 1) * NUM_FTRS,
                                     br * EMBED:(br + 1) * EMBED].set(cls_w[br])
    cls_b_fused = cls_b.reshape(1, NEMB)

    # combined head: [dd_in | m] @ w_head -> dd in lanes DD_OFF.., preds in lanes PRED_OFF..
    w_head = jnp.zeros((HEAD_IN, OUT_LANES), f32)
    w_head = w_head.at[:NEMB, DD_OFF:DD_OFF + SUBS].set(w_sub)
    w_head = w_head.at[NEMB:, PRED_OFF:PRED_OFF + CLASSES].set(w_cls2)
    b_head = jnp.zeros((1, OUT_LANES), f32)
    b_head = b_head.at[0, DD_OFF:DD_OFF + SUBS].set(b_sub)
    b_head = b_head.at[0, PRED_OFF:PRED_OFF + CLASSES].set(b_cls2)

    return {
        # raw per-branch / per-head params (reference path, mirrors the PyTorch module)
        "conv_w": conv_w, "cls_w": cls_w, "cls_b": cls_b,
        "w_sub": w_sub, "b_sub": b_sub, "w_cls2": w_cls2, "b_cls2": b_cls2,
        "pool": pool,
        # packed / fused kernel params (bf16 weights, f32 biases)
        "conv_w_fused": conv_w_fused.astype(jnp.bfloat16),
        "cls_w_fused": cls_w_fused.astype(jnp.bfloat16),
        "cls_b_fused": cls_b_fused,
        "w_head": w_head.astype(jnp.bfloat16),
        "b_head": b_head,
    }


if __name__ == "__main__":
    params = init_params()
    # inp mirrors the PyTorch `inp` sequence of 3 NCHW images: [3, B, CIN, H, W]
    inp = jax.random.normal(jax.random.PRNGKey(0), (3, B, CIN, H, W), jnp.float32)

    preds, dd_out = multibranch_forward(inp, params)
    jax.block_until_ready((preds, dd_out))

    ref_preds, ref_dd = reference_forward(inp, params)
    assert preds.shape == (B, CLASSES) and dd_out.shape == (B, SUBS)
    assert jnp.allclose(preds, ref_preds, atol=2e-3, rtol=2e-3)
    assert jnp.allclose(dd_out, ref_dd, atol=2e-3, rtol=2e-3)

    print("KERNEL_OK")
</pallas_src>

<mosaic_0001>
module attributes {stable_mosaic.version = 11 : i64} {
  func.func @fused_kernel(%arg0: i32, %arg1: memref<512x128xbf16, #tpu.memory_space<vmem>>, %arg2: memref<128x192xbf16, #tpu.memory_space<vmem>>, %arg3: memref<2x512xbf16, #tpu.memory_space<vmem>>, %arg4: memref<192x384xbf16, #tpu.memory_space<vmem>>, %arg5: memref<1x384xf32, #tpu.memory_space<vmem>>, %arg6: memref<512x128xbf16, #tpu.memory_space<vmem>>, %arg7: memref<1x128xf32, #tpu.memory_space<vmem>>, %arg8: memref<2x128xf32, #tpu.memory_space<vmem>>) attributes {dimension_semantics = [#tpu.dimension_semantics<arbitrary>], iteration_bounds = array<i64: 1>, scalar_prefetch = 0 : i64, scratch_operands = 0 : i64, tpu.core_type = #tpu.core_type<tc>, window_params = [{pipeline_mode = #tpu.pipeline_mode<synchronous>, transform_indices = @transform_0, window_bounds = array<i64: 512, 128>}, {pipeline_mode = #tpu.pipeline_mode<synchronous>, transform_indices = @transform_1, window_bounds = array<i64: 128, 192>}, {pipeline_mode = #tpu.pipeline_mode<synchronous>, transform_indices = @transform_2, window_bounds = array<i64: 2, 512>}, {pipeline_mode = #tpu.pipeline_mode<synchronous>, transform_indices = @transform_3, window_bounds = array<i64: 192, 384>}, {pipeline_mode = #tpu.pipeline_mode<synchronous>, transform_indices = @transform_4, window_bounds = array<i64: 1, 384>}, {pipeline_mode = #tpu.pipeline_mode<synchronous>, transform_indices = @transform_5, window_bounds = array<i64: 512, 128>}, {pipeline_mode = #tpu.pipeline_mode<synchronous>, transform_indices = @transform_6, window_bounds = array<i64: 1, 128>}, {pipeline_mode = #tpu.pipeline_mode<synchronous>, transform_indices = @transform_7, window_bounds = array<i64: 2, 128>}]} {
    %c0 = arith.constant 0 : index
    %c0_0 = arith.constant 0 : index
    %0 = vector.load %arg1[%c0, %c0_0] : memref<512x128xbf16, #tpu.memory_space<vmem>>, vector<512x128xbf16>
    %c0_1 = arith.constant 0 : index
    %c0_2 = arith.constant 0 : index
    %1 = vector.load %arg2[%c0_1, %c0_2] : memref<128x192xbf16, #tpu.memory_space<vmem>>, vector<128x192xbf16>
    %cst = arith.constant dense<0.000000e+00> : vector<512x192xf32>
    %2 = tpu.matmul %0, %1, %cst {dimension_numbers = #tpu.dot_dimension_numbers<[1], [0], [0], [1], [0, 0, 1, 1], [], []>} : vector<512x128xbf16>, vector<128x192xbf16>, vector<512x192xf32> -> vector<512x192xf32>
    %cst_3 = arith.constant 0.000000e+00 : f32
    %3 = vector.broadcast %cst_3 : f32 to vector<512x192xf32>
    %4 = arith.maximumf %2, %3 : vector<512x192xf32>
    %c0_4 = arith.constant 0 : index
    %c0_5 = arith.constant 0 : index
    %5 = vector.load %arg3[%c0_4, %c0_5] : memref<2x512xbf16, #tpu.memory_space<vmem>>, vector<2x512xbf16>
    %6 = arith.truncf %4 : vector<512x192xf32> to vector<512x192xbf16>
    %cst_6 = arith.constant dense<0.000000e+00> : vector<2x192xf32>
    %7 = tpu.matmul %5, %6, %cst_6 {dimension_numbers = #tpu.dot_dimension_numbers<[1], [0], [0], [1], [0, 0, 1, 1], [], []>} : vector<2x512xbf16>, vector<512x192xbf16>, vector<2x192xf32> -> vector<2x192xf32>
    %8 = arith.truncf %7 : vector<2x192xf32> to vector<2x192xbf16>
    %c0_7 = arith.constant 0 : index
    %c0_8 = arith.constant 0 : index
    %9 = vector.load %arg4[%c0_7, %c0_8] : memref<192x384xbf16, #tpu.memory_space<vmem>>, vector<192x384xbf16>
    %cst_9 = arith.constant dense<0.000000e+00> : vector<2x384xf32>
    %10 = tpu.matmul %8, %9, %cst_9 {dimension_numbers = #tpu.dot_dimension_numbers<[1], [0], [0], [1], [0, 0, 1, 1], [], []>} : vector<2x192xbf16>, vector<192x384xbf16>, vector<2x384xf32> -> vector<2x384xf32>
    %c0_10 = arith.constant 0 : index
    %c0_11 = arith.constant 0 : index
    %11 = vector.load %arg5[%c0_10, %c0_11] : memref<1x384xf32, #tpu.memory_space<vmem>>, vector<1x384xf32>
    %12 = vector.broadcast %11 : vector<1x384xf32> to vector<2x384xf32>
    %13 = arith.addf %10, %12 : vector<2x384xf32>
    %14 = vector.extract_strided_slice %13 {offsets = [0, 0], sizes = [2, 128], strides = [1, 1]} : vector<2x384xf32> to vector<2x128xf32>
    %15 = vector.extract_strided_slice %13 {offsets = [0, 128], sizes = [2, 128], strides = [1, 1]} : vector<2x384xf32> to vector<2x128xf32>
    %16 = vector.extract_strided_slice %13 {offsets = [0, 256], sizes = [2, 128], strides = [1, 1]} : vector<2x384xf32> to vector<2x128xf32>
    %17 = arith.maximumf %14, %15 : vector<2x128xf32>
    %18 = arith.maximumf %17, %16 : vector<2x128xf32>
    %cst_12 = arith.constant 0.000000e+00 : f32
    %19 = vector.broadcast %cst_12 : f32 to vector<2x128xf32>
    %20 = arith.cmpf oge, %18, %19 : vector<2x128xf32>
    %cst_13 = arith.constant 0.00999999977 : f32
    %21 = vector.broadcast %cst_13 : f32 to vector<2x128xf32>
    %22 = arith.mulf %21, %18 : vector<2x128xf32>
    %23 = arith.select %20, %18, %22 : vector<2x128xi1>, vector<2x128xf32>
    %24 = tpu.concatenate %14, %15, %16 in 0 : vector<2x128xf32>, vector<2x128xf32>, vector<2x128xf32> -> vector<6x128xf32>
    %25 = vector.extract_strided_slice %24 {offsets = [0, 0], sizes = [1, 128], strides = [1, 1]} : vector<6x128xf32> to vector<1x128xf32>
    %26 = vector.extract_strided_slice %24 {offsets = [1, 0], sizes = [1, 128], strides = [1, 1]} : vector<6x128xf32> to vector<1x128xf32>
    %27 = vector.extract_strided_slice %24 {offsets = [2, 0], sizes = [1, 128], strides = [1, 1]} : vector<6x128xf32> to vector<1x128xf32>
    %28 = tpu.concatenate %25, %26, %27 in 1 : vector<1x128xf32>, vector<1x128xf32>, vector<1x128xf32> -> vector<1x384xf32>
    %29 = vector.extract_strided_slice %24 {offsets = [3, 0], sizes = [1, 128], strides = [1, 1]} : vector<6x128xf32> to vector<1x128xf32>
    %30 = vector.extract_strided_slice %24 {offsets = [4, 0], sizes = [1, 128], strides = [1, 1]} : vector<6x128xf32> to vector<1x128xf32>
    %31 = vector.extract_strided_slice %24 {offsets = [5, 0], sizes = [1, 128], strides = [1, 1]} : vector<6x128xf32> to vector<1x128xf32>
    %32 = tpu.concatenate %29, %30, %31 in 1 : vector<1x128xf32>, vector<1x128xf32>, vector<1x128xf32> -> vector<1x384xf32>
    %33 = tpu.concatenate %28, %32 in 0 : vector<1x384xf32>, vector<1x384xf32> -> vector<2x384xf32>
    %34 = tpu.concatenate %33, %23 in 1 : vector<2x384xf32>, vector<2x128xf32> -> vector<2x512xf32>
    %35 = arith.truncf %34 : vector<2x512xf32> to vector<2x512xbf16>
    %c0_14 = arith.constant 0 : index
    %c0_15 = arith.constant 0 : index
    %36 = vector.load %arg6[%c0_14, %c0_15] : memref<512x128xbf16, #tpu.memory_space<vmem>>, vector<512x128xbf16>
    %cst_16 = arith.constant dense<0.000000e+00> : vector<2x128xf32>
    %37 = tpu.matmul %35, %36, %cst_16 {dimension_numbers = #tpu.dot_dimension_numbers<[1], [0], [0], [1], [0, 0, 1, 1], [], []>} : vector<2x512xbf16>, vector<512x128xbf16>, vector<2x128xf32> -> vector<2x128xf32>
    %c0_17 = arith.constant 0 : index
    %c0_18 = arith.constant 0 : index
    %38 = vector.load %arg7[%c0_17, %c0_18] : memref<1x128xf32, #tpu.memory_space<vmem>>, vector<1x128xf32>
    %39 = vector.broadcast %38 : vector<1x128xf32> to vector<2x128xf32>
    %40 = arith.addf %37, %39 : vector<2x128xf32>
    %c0_19 = arith.constant 0 : index
    %c0_20 = arith.constant 0 : index
    %41 = vector.load %arg8[%c0_19, %c0_20] : memref<2x128xf32, #tpu.memory_space<vmem>>, vector<2x128xf32>
    tpu.vector_store %arg8[%c0_19, %c0_20], %40 {strides = array<i32>} : memref<2x128xf32, #tpu.memory_space<vmem>>, vector<2x128xf32>,
    return
  }
  func.func @transform_0(%arg0: i32) -> (i32, i32) {
    %c0_i32 = arith.constant 0 : i32
    %c0_i32_0 = arith.constant 0 : i32
    %c0_i32_1 = arith.constant 0 : i32
    return %c0_i32, %c0_i32_0 : i32, i32
  }
  func.func @transform_1(%arg0: i32) -> (i32, i32) {
    %c0_i32 = arith.constant 0 : i32
    %c0_i32_0 = arith.constant 0 : i32
    %c0_i32_1 = arith.constant 0 : i32
    return %c0_i32, %c0_i32_0 : i32, i32
  }
  func.func @transform_2(%arg0: i32) -> (i32, i32) {
    %c0_i32 = arith.constant 0 : i32
    %c0_i32_0 = arith.constant 0 : i32
    %c0_i32_1 = arith.constant 0 : i32
    return %c0_i32, %c0_i32_0 : i32, i32
  }
  func.func @transform_3(%arg0: i32) -> (i32, i32) {
    %c0_i32 = arith.constant 0 : i32
    %c0_i32_0 = arith.constant 0 : i32
    %c0_i32_1 = arith.constant 0 : i32
    return %c0_i32, %c0_i32_0 : i32, i32
  }
  func.func @transform_4(%arg0: i32) -> (i32, i32) {
    %c0_i32 = arith.constant 0 : i32
    %c0_i32_0 = arith.constant 0 : i32
    %c0_i32_1 = arith.constant 0 : i32
    return %c0_i32, %c0_i32_0 : i32, i32
  }
  func.func @transform_5(%arg0: i32) -> (i32, i32) {
    %c0_i32 = arith.constant 0 : i32
    %c0_i32_0 = arith.constant 0 : i32
    %c0_i32_1 = arith.constant 0 : i32
    return %c0_i32, %c0_i32_0 : i32, i32
  }
  func.func @transform_6(%arg0: i32) -> (i32, i32) {
    %c0_i32 = arith.constant 0 : i32
    %c0_i32_0 = arith.constant 0 : i32
    %c0_i32_1 = arith.constant 0 : i32
    return %c0_i32, %c0_i32_0 : i32, i32
  }
  func.func @transform_7(%arg0: i32) -> (i32, i32) {
    %c0_i32 = arith.constant 0 : i32
    %c0_i32_0 = arith.constant 0 : i32
    %c0_i32_1 = arith.constant 0 : i32
    return %c0_i32, %c0_i32_0 : i32, i32
  }
}

</mosaic_0001>

<bundles_post_ra>
// kernel: multibranch_forward.1
= control target key start
LH: loop header
LB: loop body
LE: loop exit
PB: predicated region body
PF: predicated region fallthrough
CT: control target
= control target key end

     0   :  { %vm1274_vm0 = vcmask 523264   ;;  %vm1367_vm1 = vcmask 1041408   ;;  %vm1369_vm2 = vcmask 1043456   ;;  %vm1380_vm3 = vcmask 1040384   ;;  %s3087_s1 = inlined_call_operand.vmem [shape: bf16[128,192], index: 1, kind: input, shape index: {}]   ;;  %s3088_s0 = inlined_call_operand.vmem [shape: bf16[512,128], index: 0, kind: input, shape index: {}]   ;;  %s3089_s2 = inlined_call_operand.vmem [shape: bf16[2,512], index: 2, kind: input, shape index: {}]   ;;  %s3090_s3 = inlined_call_operand.vmem [shape: bf16[192,384], index: 3, kind: input, shape index: {}]   ;;  %s3091_s5 = inlined_call_operand.vmem [shape: bf16[512,128], index: 5, kind: input, shape index: {}]   ;;  %s3092_s6 = inlined_call_operand.vmem [shape: f32[1,128], index: 6, kind: input, shape index: {}]   ;;  %s3093_s4 = inlined_call_operand.vmem [shape: f32[1,384], index: 4, kind: input, shape index: {}]   ;;  %s3094_s7 = inlined_call_operand.vmem [shape: f32[2,128], index: 7, kind: output, shape index: {}]  }
   0x1   :  { %v1891_v0 = vld [vmem:[%s3087_s1 + $0x70] sm:$0xf]  ;;  %v2219_v1 = vld [vmem:[%s3087_s1 + $0x74] sm:$0xf0]  ;;  %v1883_v2 = vld [vmem:[%s3087_s1 + $0x60] sm:$0xf] }
   0x2   :  { %v1892_v3 = vor.u32 %v2219_v1, %v1891_v0  ;;  %v2217_v4 = vld [vmem:[%s3087_s1 + $0x64] sm:$0xf0]  ;;  %v1875_v6 = vld [vmem:[%s3087_s1 + $0x50] sm:$0xf]  ;;  %v2215_v7 = vld [vmem:[%s3087_s1 + $0x54] sm:$0xf0] }
   0x3   :  { %v1884_v5 = vor.u32 %v2217_v4, %v1883_v2  ;;  %v1876_v8 = vor.u32 %v2215_v7, %v1875_v6  ;;  %v1867_v9 = vld [vmem:[%s3087_s1 + $0x40] sm:$0xf]  ;;  %v2213_v10 = vld [vmem:[%s3087_s1 + $0x44] sm:$0xf0]  ;;  %v1859_v12 = vld [vmem:[%s3087_s1 + $0x30] sm:$0xf] }
   0x4   :  { %379 = vmatpush.bf16.msra.mxu0 %v1892_v3  ;;  %2288 = vmatpush.bf16.msra.mxu3 %v1892_v3  ;;  %v1868_v11 = vor.u32 %v2213_v10, %v1867_v9  ;;  %v2211_v13 = vld [vmem:[%s3087_s1 + $0x34] sm:$0xf0]  ;;  %v1851_v15 = vld [vmem:[%s3087_s1 + $0x20] sm:$0xf]  ;;  %v2209_v16 = vld [vmem:[%s3087_s1 + $0x24] sm:$0xf0] }
   0x5   :  { %v1860_v14 = vor.u32 %v2211_v13, %v1859_v12  ;;  %v2218_v17 = vld [vmem:[%s3087_s1 + $0x74] sm:$0xf]  ;;  %v1893_v18 = vld [vmem:[%s3087_s1 + $0x78] sm:$0xf0]  ;;  %v2216_v19 = vld [vmem:[%s3087_s1 + $0x64] sm:$0xf]  ;;  %v1852_v20 = vor.u32 %v2209_v16, %v1851_v15 }
   0x6   :  { %v1896_v21 = vor.u32 %v2218_v17, %v1893_v18  ;;  %v1885_v22 = vld [vmem:[%s3087_s1 + $0x68] sm:$0xf0]  ;;  %v1843_v23 = vld [vmem:[%s3087_s1 + $0x10] sm:$0xf]  ;;  %v2207_v24 = vld [vmem:[%s3087_s1 + $0x14] sm:$0xf0] }
   0x7   :  { %v1888_v25 = vor.u32 %v2216_v19, %v1885_v22  ;;  %v2214_v26 = vld [vmem:[%s3087_s1 + $0x54] sm:$0xf]  ;;  %v1877_v27 = vld [vmem:[%s3087_s1 + $0x58] sm:$0xf0]  ;;  %v1844_v28 = vor.u32 %v2207_v24, %v1843_v23  ;;  %v1835_v29 = vld [vmem:[%s3087_s1] sm:$0xf] }
   0x8   :  { %380 = vmatpush.bf16.msra.mxu0 %v1884_v5  ;;  %2289 = vmatpush.bf16.msra.mxu3 %v1884_v5  ;;  %v2205_v30 = vld [vmem:[%s3087_s1 + $0x4] sm:$0xf0]  ;;  %v1880_v31 = vor.u32 %v2214_v26, %v1877_v27  ;;  %v2212_v32 = vld [vmem:[%s3087_s1 + $0x44] sm:$0xf]  ;;  %v1869_v33 = vld [vmem:[%s3087_s1 + $0x48] sm:$0xf0] }
   0x9   :  { %548 = vmatpush.bf16.msra.mxu1 %v1896_v21  ;;  %2296 = vmatpush.bf16.msra.mxu2 %v1896_v21  ;;  %v1836_v34 = vor.u32 %v2205_v30, %v1835_v29  ;;  %v1872_v35 = vor.u32 %v2212_v32, %v1869_v33  ;;  %v2172_v36 = vld [vmem:[%s3088_s0] sm:$0xff]  ;;  %v2210_v37 = vld [vmem:[%s3087_s1 + $0x34] sm:$0xf]  ;;  %v1861_v38 = vld [vmem:[%s3087_s1 + $0x38] sm:$0xf0] }
   0xa   :  { %v2208_v39 = vld [vmem:[%s3087_s1 + $0x24] sm:$0xf]  ;;  %v1864_v40 = vor.u32 %v2210_v37, %v1861_v38  ;;  %v1853_v41 = vld [vmem:[%s3087_s1 + $0x28] sm:$0xf0]  ;;  %v2206_v43 = vld [vmem:[%s3087_s1 + $0x14] sm:$0xf] }
   0xb   :  { %v1856_v42 = vor.u32 %v2208_v39, %v1853_v41  ;;  %v1845_v44 = vld [vmem:[%s3087_s1 + $0x18] sm:$0xf0]  ;;  %v2204_v46 = vld [vmem:[%s3087_s1 + $0x4] sm:$0xf]  ;;  %v1837_v47 = vld [vmem:[%s3087_s1 + $0x8] sm:$0xf0] }
   0xc   :  { %381 = vmatpush.bf16.msra.mxu0 %v1876_v8  ;;  %2290 = vmatpush.bf16.msra.mxu3 %v1876_v8  ;;  %v1848_v45 = vor.u32 %v2206_v43, %v1845_v44  ;;  %v1840_v48 = vor.u32 %v2204_v46, %v1837_v47  ;;  %v2173_v49 = vld [vmem:[%s3088_s0 + $0x8] sm:$0xff]  ;;  %v2174_v50 = vld [vmem:[%s3088_s0 + $0x10] sm:$0xff]  ;;  %v2175_v51 = vld [vmem:[%s3088_s0 + $0x18] sm:$0xff] }
   0xd   :  { %549 = vmatpush.bf16.msra.mxu1 %v1888_v25  ;;  %2297 = vmatpush.bf16.msra.mxu2 %v1888_v25  ;;  %v2176_v52 = vld [vmem:[%s3088_s0 + $0x20] sm:$0xff]  ;;  %v2177_v53 = vld [vmem:[%s3088_s0 + $0x28] sm:$0xff]  ;;  %v2178_v54 = vld [vmem:[%s3088_s0 + $0x30] sm:$0xff] }
   0xe   :  { %v2179_v55 = vld [vmem:[%s3088_s0 + $0x38] sm:$0xff]  ;;  %v2196_v56 = vld [vmem:[%s3088_s0 + $0xc0] sm:$0xff]  ;;  %v2197_v60 = vld [vmem:[%s3088_s0 + $0xc8] sm:$0xff] }
   0xf   :  { %v2180_v57 = vld [vmem:[%s3088_s0 + $0x40] sm:$0xff]  ;;  %v2181_v0 = vld [vmem:[%s3088_s0 + $0x48] sm:$0xff]  ;;  %v2198_v4 = vld [vmem:[%s3088_s0 + $0xd0] sm:$0xff] }
  0x10   :  { %382 = vmatpush.bf16.msra.mxu0 %v1868_v11  ;;  %2291 = vmatpush.bf16.msra.mxu3 %v1868_v11  ;;  %v2182_v12 = vld [vmem:[%s3088_s0 + $0x50] sm:$0xff]  ;;  %v2199_v16 = vld [vmem:[%s3088_s0 + $0xd8] sm:$0xff] }
  0x11   :  { %550 = vmatpush.bf16.msra.mxu1 %v1880_v31  ;;  %2298 = vmatpush.bf16.msra.mxu2 %v1880_v31  ;;  %v2183_v24 = vld [vmem:[%s3088_s0 + $0x58] sm:$0xff] }
  0x14   :  { %383 = vmatpush.bf16.msra.mxu0 %v1860_v14  ;;  %2292 = vmatpush.bf16.msra.mxu3 %v1860_v14 }
  0x15   :  { %551 = vmatpush.bf16.msra.mxu1 %v1872_v35  ;;  %2299 = vmatpush.bf16.msra.mxu2 %v1872_v35 }
  0x18   :  { %384 = vmatpush.bf16.msra.mxu0 %v1852_v20  ;;  %2293 = vmatpush.bf16.msra.mxu3 %v1852_v20 }
  0x19   :  { %552 = vmatpush.bf16.msra.mxu1 %v1864_v40  ;;  %2300 = vmatpush.bf16.msra.mxu2 %v1864_v40  ;;  %v2201_v40 = vld [vmem:[%s3088_s0 + $0xe8] sm:$0xff] }
  0x1c   :  { %385 = vmatpush.bf16.msra.mxu0 %v1844_v28  ;;  %2294 = vmatpush.bf16.msra.mxu3 %v1844_v28  ;;  %v2200_v28 = vld [vmem:[%s3088_s0 + $0xe0] sm:$0xff] }
  0x1d   :  { %553 = vmatpush.bf16.msra.mxu1 %v1856_v42  ;;  %2301 = vmatpush.bf16.msra.mxu2 %v1856_v42 }
  0x20   :  { %386 = vmatpush.bf16.msra.mxu0 %v1836_v34  ;;  %2295 = vmatpush.bf16.msra.mxu3 %v1836_v34 }
  0x21   :  { %554 = vmatpush.bf16.msra.mxu1 %v1848_v45  ;;  %2302 = vmatpush.bf16.msra.mxu2 %v1848_v45  ;;  %v2185_v45 = vld [vmem:[%s3088_s0 + $0x68] sm:$0xff] }
  0x23   :  { %387 = vmatmul.bf16.vlgmr.msra.gmra.mxu0 %v2172_v36  ;;  %507 = vmatmul.bf16.vlgmr.msra.gmra.mxu3 %v2196_v56 }
  0x25   :  { %555 = vmatpush.bf16.msra.mxu1 %v1840_v48  ;;  %2303 = vmatpush.bf16.msra.mxu2 %v1840_v48 }
  0x28   :  { %556 = vmatmul.bf16.vlgmr.msra.gmra.mxu1 %v2172_v36  ;;  %676 = vmatmul.bf16.vlgmr.msra.gmra.mxu2 %v2196_v56  ;;  %v2184_v36 = vld [vmem:[%s3088_s0 + $0x60] sm:$0xff] }
  0x33   :  { %392 = vmatmul.bf16.gmra.mxu0 %v2173_v49  ;;  %512 = vmatmul.bf16.gmra.mxu3 %v2197_v60 }
  0x38   :  { %561 = vmatmul.bf16.gmra.mxu1 %v2173_v49  ;;  %681 = vmatmul.bf16.gmra.mxu2 %v2197_v60  ;;  %v2202_v49 = vld [vmem:[%s3088_s0 + $0xf0] sm:$0xff] }
  0x43   :  { %397 = vmatmul.bf16.gmra.mxu0 %v2174_v50  ;;  %517 = vmatmul.bf16.gmra.mxu3 %v2198_v4 }
  0x48   :  { %566 = vmatmul.bf16.gmra.mxu1 %v2174_v50  ;;  %686 = vmatmul.bf16.gmra.mxu2 %v2198_v4 }
  0x53   :  { %402 = vmatmul.bf16.gmra.mxu0 %v2175_v51  ;;  %522 = vmatmul.bf16.gmra.mxu3 %v2199_v16 }
  0x58   :  { %571 = vmatmul.bf16.gmra.mxu1 %v2175_v51  ;;  %691 = vmatmul.bf16.gmra.mxu2 %v2199_v16 }
  0x63   :  { %407 = vmatmul.bf16.gmra.mxu0 %v2176_v52  ;;  %527 = vmatmul.bf16.gmra.mxu3 %v2200_v28 }
  0x68   :  { %576 = vmatmul.bf16.gmra.mxu1 %v2176_v52  ;;  %696 = vmatmul.bf16.gmra.mxu2 %v2200_v28 }
  0x73   :  { %412 = vmatmul.bf16.gmra.mxu0 %v2177_v53  ;;  %532 = vmatmul.bf16.gmra.mxu3 %v2201_v40 }
  0x78   :  { %581 = vmatmul.bf16.gmra.mxu1 %v2177_v53  ;;  %701 = vmatmul.bf16.gmra.mxu2 %v2201_v40 }
  0x83   :  { %417 = vmatmul.bf16.gmra.mxu0 %v2178_v54  ;;  %537 = vmatmul.bf16.gmra.mxu3 %v2202_v49 }
  0x88   :  { %586 = vmatmul.bf16.gmra.mxu1 %v2178_v54  ;;  %706 = vmatmul.bf16.gmra.mxu2 %v2202_v49  ;;  %v2186_v54 = vld [vmem:[%s3088_s0 + $0x70] sm:$0xff] }
  0x93   :  { %422 = vmatmul.bf16.gmra.mxu0 %v2179_v55 }
  0x98   :  { %591 = vmatmul.bf16.gmra.mxu1 %v2179_v55 }
  0xa0   :  { %v388_v58 = vpop.f32.mrf.mxu0 }
  0xa1   :  { %v717_v61 = vmax.f32 %v388_v58, 0.0  ;;  %v2203_v58 = vld [vmem:[%s3088_s0 + $0xf8] sm:$0xff] }
  0xa2   :  { %542 = vmatmul.bf16.gmra.mxu3 %v2203_v58  ;;  %711 = vmatmul.bf16.gmra.mxu2 %v2203_v58 }
  0xa3   :  { %427 = vmatmul.bf16.gmra.mxu0 %v2180_v57 }
  0xa5   :  { %v557_v2 = vpop.f32.mrf.mxu1 }
  0xa6   :  { %v718_v7 = vmax.f32 %v557_v2, 0.0 }
  0xa8   :  { %v390_v59 = vpop.f32.mrf.mxu0  ;;  %596 = vmatmul.bf16.gmra.mxu1 %v2180_v57 }
  0xa9   :  { %v719_v62 = vmax.f32 %v390_v59, 0.0 }
  0xab   :  { %v2474_v63 = vpack.c.bf16 %v719_v62, %v717_v61 }
  0xad   :  { %v559_v8 = vpop.f32.mrf.mxu1 }
  0xae   :  { %v720_v9 = vmax.f32 %v559_v8, 0.0 }
  0xb0   :  { %v393_v1 = vpop.f32.mrf.mxu0  ;;  %v2484_v11 = vpack.c.bf16 %v720_v9, %v718_v7 }
  0xb1   :  { %v721_v5 = vmax.f32 %v393_v1, 0.0 }
  0xb2   :  { %3095 = vst [vmem:[#allocation2_spill] sm:$0xff] %v2484_v11 }
  0xb3   :  { %432 = vmatmul.bf16.gmra.mxu0 %v2181_v0 }
  0xb5   :  { %v562_v14 = vpop.f32.mrf.mxu1 }
  0xb6   :  { %v722_v19 = vmax.f32 %v562_v14, 0.0 }
  0xb8   :  { %v395_v3 = vpop.f32.mrf.mxu0  ;;  %601 = vmatmul.bf16.gmra.mxu1 %v2181_v0  ;;  %v2187_v0 = vld [vmem:[%s3088_s0 + $0x78] sm:$0xff] }
  0xb9   :  { %v723_v6 = vmax.f32 %v395_v3, 0.0 }
  0xbb   :  { %v2482_v10 = vpack.c.bf16 %v723_v6, %v721_v5 }
  0xbd   :  { %v564_v20 = vpop.f32.mrf.mxu1 }
  0xbe   :  { %v724_v21 = vmax.f32 %v564_v20, 0.0 }
  0xc0   :  { %v398_v13 = vpop.f32.mrf.mxu0  ;;  %v2494_v23 = vpack.c.bf16 %v724_v21, %v722_v19 }
  0xc1   :  { %v725_v17 = vmax.f32 %v398_v13, 0.0 }
  0xc2   :  { %3096 = vst [vmem:[#allocation3_spill] sm:$0xff] %v2494_v23 }
  0xc3   :  { %437 = vmatmul.bf16.gmra.mxu0 %v2182_v12 }
  0xc5   :  { %v567_v26 = vpop.f32.mrf.mxu1 }
  0xc6   :  { %v726_v31 = vmax.f32 %v567_v26, 0.0 }
  0xc8   :  { %v400_v15 = vpop.f32.mrf.mxu0  ;;  %606 = vmatmul.bf16.gmra.mxu1 %v2182_v12 }
  0xc9   :  { %v727_v18 = vmax.f32 %v400_v15, 0.0  ;;  %v2539_v15 = vpop.f32.mrf.mxu3 }
  0xcb   :  { %v2492_v22 = vpack.c.bf16 %v727_v18, %v725_v17  ;;  %v2188_v18 = vld [vmem:[%s3088_s0 + $0x80] sm:$0xff] }
  0xcd   :  { %v569_v32 = vpop.f32.mrf.mxu1 }
  0xce   :  { %v728_v33 = vmax.f32 %v569_v32, 0.0 }
  0xd0   :  { %v403_v25 = vpop.f32.mrf.mxu0  ;;  %v2504_v35 = vpack.c.bf16 %v728_v33, %v726_v31 }
  0xd1   :  { %v729_v29 = vmax.f32 %v403_v25, 0.0 }
  0xd3   :  { %442 = vmatmul.bf16.gmra.mxu0 %v2183_v24 }
  0xd5   :  { %v572_v38 = vpop.f32.mrf.mxu1 }
  0xd6   :  { %v730_v41 = vmax.f32 %v572_v38, 0.0 }
  0xd8   :  { %v405_v27 = vpop.f32.mrf.mxu0  ;;  %611 = vmatmul.bf16.gmra.mxu1 %v2183_v24 }
  0xd9   :  { %v731_v30 = vmax.f32 %v405_v27, 0.0  ;;  %v2546_v27 = vpop.f32.mrf.mxu3 }
  0xdb   :  { %v2502_v34 = vpack.c.bf16 %v731_v30, %v729_v29 }
  0xdd   :  { %v574_v42 = vpop.f32.mrf.mxu1 }
  0xde   :  { %v732_v43 = vmax.f32 %v574_v42, 0.0 }
  0xe0   :  { %v2509_v37 = vpop.f32.mrf.mxu0  ;;  %v2516_v44 = vpack.c.bf16 %v732_v43, %v730_v41 }
  0xe1   :  { %v733_v26 = vmax.f32 %v2509_v37, 0.0  ;;  %v2553_v40 = vpop.f32.mrf.mxu3  ;;  %v2189_v37 = vld [vmem:[%s3088_s0 + $0x88] sm:$0xff] }
  0xe3   :  { %447 = vmatmul.bf16.gmra.mxu0 %v2184_v36 }
  0xe5   :  { %v577_v47 = vpop.f32.mrf.mxu1 }
  0xe6   :  { %v734_v50 = vmax.f32 %v577_v47, 0.0 }
  0xe8   :  { %v2511_v39 = vpop.f32.mrf.mxu0  ;;  %616 = vmatmul.bf16.gmra.mxu1 %v2184_v36 }
  0xe9   :  { %v735_v24 = vmax.f32 %v2511_v39, 0.0  ;;  %v2560_v43 = vpop.f32.mrf.mxu3 }
  0xeb   :  { %v854_v28 = vpack.c.bf16 %v735_v24, %v733_v26 }
  0xed   :  { %v579_v51 = vpop.f32.mrf.mxu1 }
  0xee   :  { %v736_v52 = vmax.f32 %v579_v51, 0.0 }
  0xf0   :  { %v413_v46 = vpop.f32.mrf.mxu0  ;;  %v2524_v53 = vpack.c.bf16 %v736_v52, %v734_v50 }
  0xf1   :  { %v737_v20 = vmax.f32 %v413_v46, 0.0  ;;  %v2570_v52 = vpop.f32.mrf.mxu3 }
  0xf3   :  { %452 = vmatmul.bf16.gmra.mxu0 %v2185_v45 }
  0xf5   :  { %v582_v56 = vpop.f32.mrf.mxu1 }
  0xf6   :  { %v738_v59 = vmax.f32 %v582_v56, 0.0 }
  0xf8   :  { %v415_v48 = vpop.f32.mrf.mxu0  ;;  %621 = vmatmul.bf16.gmra.mxu1 %v2185_v45 }
  0xf9   :  { %v739_v16 = vmax.f32 %v415_v48, 0.0 }
  0xfb   :  { %v856_v25 = vpack.c.bf16 %v739_v16, %v737_v20 }
  0xfd   :  { %v584_v60 = vpop.f32.mrf.mxu1 }
  0xfe   :  { %v740_v61 = vmax.f32 %v584_v60, 0.0 }
 0x100   :  { %v418_v55 = vpop.f32.mrf.mxu0  ;;  %v2532_v62 = vpack.c.bf16 %v740_v61, %v738_v59  ;;  %v2572_v59 = vpop.f32.mrf.mxu3 }
 0x101   :  { %v741_v13 = vmax.f32 %v418_v55, 0.0 }
 0x103   :  { %457 = vmatmul.bf16.gmra.mxu0 %v2186_v54 }
 0x105   :  { %v587_v2 = vpop.f32.mrf.mxu1 }
 0x106   :  { %v742_v6 = vmax.f32 %v587_v2, 0.0 }
 0x108   :  { %v420_v57 = vpop.f32.mrf.mxu0  ;;  %626 = vmatmul.bf16.gmra.mxu1 %v2186_v54 }
 0x109   :  { %v743_v8 = vmax.f32 %v420_v57, 0.0 }
 0x10b   :  { %v858_v17 = vpack.c.bf16 %v743_v8, %v741_v13 }
 0x10d   :  { %v589_v7 = vpop.f32.mrf.mxu1 }
 0x10e   :  { %v744_v12 = vmax.f32 %v589_v7, 0.0 }
 0x110   :  { %v423_v1 = vpop.f32.mrf.mxu0  ;;  %v2537_v14 = vpack.c.bf16 %v744_v12, %v742_v6 }
 0x111   :  { %v745_v4 = vmax.f32 %v423_v1, 0.0  ;;  %v2191_v1 = vld [vmem:[%s3088_s0 + $0x98] sm:$0xff] }
 0x113   :  { %462 = vmatmul.bf16.gmra.mxu0 %v2187_v0 }
 0x115   :  { %v592_v21 = vpop.f32.mrf.mxu1 }
 0x116   :  { %v746_v32 = vmax.f32 %v592_v21, 0.0 }
 0x118   :  { %v425_v3 = vpop.f32.mrf.mxu0  ;;  %631 = vmatmul.bf16.gmra.mxu1 %v2187_v0 }
 0x119   :  { %v747_v5 = vmax.f32 %v425_v3, 0.0 }
 0x11b   :  { %v860_v9 = vpack.c.bf16 %v747_v5, %v745_v4  ;;  %v2581_v4 = vpop.f32.mrf.mxu2  ;;  %v2583_v5 = vpop.f32.mrf.mxu3 }
 0x11d   :  { %920 = vmatpush.bf16.msrb.mxu2 %v860_v9  ;;  %v594_v33 = vpop.f32.mrf.mxu1 }
 0x11e   :  { %v748_v36 = vmax.f32 %v594_v33, 0.0  ;;  %v2193_v33 = vld [vmem:[%s3088_s0 + $0xa8] sm:$0xff] }
 0x120   :  { %v428_v19 = vpop.f32.mrf.mxu0  ;;  %v2551_v39 = vpack.c.bf16 %v748_v36, %v746_v32 }
 0x121   :  { %921 = vmatpush.bf16.msrb.mxu2 %v858_v17  ;;  %v749_v30 = vmax.f32 %v428_v19, 0.0  ;;  %v2192_v19 = vld [vmem:[%s3088_s0 + $0xa0] sm:$0xff] }
 0x123   :  { %467 = vmatmul.bf16.gmra.mxu0 %v2188_v18  ;;  %v2594_v20 = vpop.f32.mrf.mxu3 }
 0x125   :  { %922 = vmatpush.bf16.msrb.mxu2 %v856_v25  ;;  %v597_v42 = vpop.f32.mrf.mxu1 }
 0x126   :  { %v750_v47 = vmax.f32 %v597_v42, 0.0 }
 0x128   :  { %v430_v29 = vpop.f32.mrf.mxu0  ;;  %636 = vmatmul.bf16.gmra.mxu1 %v2188_v18  ;;  %v2589_v18 = vpop.f32.mrf.mxu2 }
 0x129   :  { %v751_v31 = vmax.f32 %v430_v29, 0.0  ;;  %923 = vmatpush.bf16.msrb.mxu2 %v854_v28 }
 0x12b   :  { %v2548_v38 = vpack.c.bf16 %v751_v31, %v749_v30  ;;  %v2598_v28 = vpop.f32.mrf.mxu3 }
 0x12d   :  { %924 = vmatpush.bf16.msrb.mxu2 %v2502_v34  ;;  %v599_v48 = vpop.f32.mrf.mxu1 }
 0x12e   :  { %v752_v49 = vmax.f32 %v599_v48, 0.0  ;;  %v2194_v48 = vld [vmem:[%s3088_s0 + $0xb0] sm:$0xff] }
 0x130   :  { %v433_v41 = vpop.f32.mrf.mxu0  ;;  %v2565_v51 = vpack.c.bf16 %v752_v49, %v750_v47  ;;  %v2596_v25 = vpop.f32.mrf.mxu2 }
 0x131   :  { %925 = vmatpush.bf16.msrb.mxu2 %v2492_v22  ;;  %v753_v34 = vmax.f32 %v433_v41, 0.0  ;;  %v2190_v22 = vld [vmem:[%s3088_s0 + $0x90] sm:$0xff] }
 0x133   :  { %472 = vmatmul.bf16.gmra.mxu0 %v2189_v37  ;;  %v2609_v42 = vpop.f32.mrf.mxu3 }
 0x135   :  { %926 = vmatpush.bf16.msrb.mxu2 %v2482_v10  ;;  %v602_v54 = vpop.f32.mrf.mxu1 }
 0x136   :  { %v754_v57 = vmax.f32 %v602_v54, 0.0 }
 0x138   :  { %v435_v45 = vpop.f32.mrf.mxu0  ;;  %641 = vmatmul.bf16.gmra.mxu1 %v2189_v37  ;;  %v2605_v37 = vpop.f32.mrf.mxu2 }
 0x139   :  { %v755_v46 = vmax.f32 %v435_v45, 0.0  ;;  %927 = vmatpush.bf16.msrb.mxu2 %v2474_v63 }
 0x13b   :  { %v2563_v50 = vpack.c.bf16 %v755_v46, %v753_v34  ;;  %v2615_v47 = vpop.f32.mrf.mxu3 }
 0x13d   :  { %v604_v58 = vpop.f32.mrf.mxu1 }
 0x13e   :  { %v756_v60 = vmax.f32 %v604_v58, 0.0 }
 0x140   :  { %v438_v10 = vpop.f32.mrf.mxu0  ;;  %v2576_v0 = vpack.c.bf16 %v756_v60, %v754_v57  ;;  %v2613_v46 = vpop.f32.mrf.mxu2 }
 0x141   :  { %v757_v56 = vmax.f32 %v438_v10, 0.0 }
 0x143   :  { %477 = vmatmul.bf16.gmra.mxu0 %v2190_v22  ;;  %v2624_v54 = vpop.f32.mrf.mxu3 }
 0x145   :  { %v607_v3 = vpop.f32.mrf.mxu1 }
 0x146   :  { %v758_v9 = vmax.f32 %v607_v3, 0.0 }
 0x148   :  { %v440_v55 = vpop.f32.mrf.mxu0  ;;  %646 = vmatmul.bf16.gmra.mxu1 %v2190_v22  ;;  %v2622_v10 = vpop.f32.mrf.mxu2 }
 0x149   :  { %v759_v63 = vmax.f32 %v440_v55, 0.0 }
 0x14b   :  { %v2574_v61 = vpack.c.bf16 %v759_v63, %v757_v56  ;;  %v2195_v63 = vld [vmem:[%s3088_s0 + $0xb8] sm:$0xff]  ;;  %v538_v60 = vpop.f32.mrf.mxu3 }
 0x14d   :  { %v609_v12 = vpop.f32.mrf.mxu1 }
 0x14e   :  { %v760_v13 = vmax.f32 %v609_v12, 0.0 }
 0x150   :  { %v443_v2 = vpop.f32.mrf.mxu0  ;;  %v2587_v17 = vpack.c.bf16 %v760_v13, %v758_v9  ;;  %v2631_v57 = vpop.f32.mrf.mxu2 }
 0x151   :  { %v761_v7 = vmax.f32 %v443_v2, 0.0 }
 0x153   :  { %482 = vmatmul.bf16.gmra.mxu0 %v2191_v1  ;;  %v540_v13 = vpop.f32.mrf.mxu3 }
 0x155   :  { %v612_v24 = vpop.f32.mrf.mxu1 }
 0x156   :  { %v762_v29 = vmax.f32 %v612_v24, 0.0 }
 0x158   :  { %v445_v6 = vpop.f32.mrf.mxu0  ;;  %651 = vmatmul.bf16.gmra.mxu1 %v2191_v1 }
 0x159   :  { %v763_v8 = vmax.f32 %v445_v6, 0.0 }
 0x15b   :  { %v2585_v16 = vpack.c.bf16 %v763_v8, %v761_v7  ;;  %v2635_v7 = vpop.f32.mrf.mxu2  ;;  %v543_v23 = vpop.f32.mrf.mxu3 }
 0x15d   :  { %v614_v30 = vpop.f32.mrf.mxu1 }
 0x15e   :  { %v764_v31 = vmax.f32 %v614_v30, 0.0 }
 0x160   :  { %v448_v21 = vpop.f32.mrf.mxu0  ;;  %v2600_v32 = vpack.c.bf16 %v764_v31, %v762_v29 }
 0x163   :  { %487 = vmatmul.bf16.gmra.mxu0 %v2192_v19 }
 0x165   :  { %v2607_v41 = vpop.f32.mrf.mxu1 }
 0x168   :  { %v450_v26 = vpop.f32.mrf.mxu0  ;;  %656 = vmatmul.bf16.gmra.mxu1 %v2192_v19 }
 0x16d   :  { %v2611_v34 = vpop.f32.mrf.mxu1 }
 0x170   :  { %v453_v36 = vpop.f32.mrf.mxu0 }
 0x171   :  { %v769_v31 = vmax.f32 %v453_v36, 0.0 }
 0x173   :  { %492 = vmatmul.bf16.gmra.mxu0 %v2193_v33 }
 0x175   :  { %v2620_v22 = vpop.f32.mrf.mxu1 }
 0x178   :  { %v455_v45 = vpop.f32.mrf.mxu0  ;;  %661 = vmatmul.bf16.gmra.mxu1 %v2193_v33 }
 0x179   :  { %v771_v24 = vmax.f32 %v455_v45, 0.0 }
 0x17b   :  { %v872_v11 = vpack.c.bf16 %v771_v24, %v769_v31  ;;  %v837_v24 = vmax.f32 %v538_v60, 0.0 }
 0x17d   :  { %v2626_v56 = vpop.f32.mrf.mxu1 }
 0x180   :  { %v458_v49 = vpop.f32.mrf.mxu0 }
 0x181   :  { %v773_v19 = vmax.f32 %v458_v49, 0.0 }
 0x183   :  { %497 = vmatmul.bf16.gmra.mxu0 %v2194_v48 }
 0x185   :  { %v2633_v1 = vpop.f32.mrf.mxu1 }
 0x188   :  { %v460_v55 = vpop.f32.mrf.mxu0  ;;  %666 = vmatmul.bf16.gmra.mxu1 %v2194_v48  ;;  %v767_v48 = vmax.f32 %v450_v26, 0.0 }
 0x189   :  { %v775_v9 = vmax.f32 %v460_v55, 0.0 }
 0x18b   :  { %v874_v29 = vpack.c.bf16 %v775_v9, %v773_v19 }
 0x18d   :  { %v2637_v8 = vpop.f32.mrf.mxu1 }
 0x190   :  { %v463_v58 = vpop.f32.mrf.mxu0 }
 0x191   :  { %v777_v3 = vmax.f32 %v463_v58, 0.0  ;;  %v2641_v58 = vpop.f32.mrf.mxu2 }
 0x193   :  { %502 = vmatmul.bf16.gmra.mxu0 %v2195_v63 }
 0x195   :  { %v2639_v33 = vpop.f32.mrf.mxu1 }
 0x198   :  { %v465_v2 = vpop.f32.mrf.mxu0  ;;  %671 = vmatmul.bf16.gmra.mxu1 %v2195_v63  ;;  %v841_v63 = vmax.f32 %v543_v23, 0.0  ;;  %v835_v23 = vmax.f32 %v2624_v54, 0.0  ;;  %v825_v54 = vmax.f32 %v2583_v5, 0.0 }
 0x199   :  { %v779_v6 = vmax.f32 %v465_v2, 0.0  ;;  %v765_v2 = vmax.f32 %v448_v21, 0.0  ;;  %v2648_v36 = vpop.f32.mrf.mxu2  ;;  %v845_v21 = vld [vmem:[%s3089_s2] sm:$0xf] }
 0x19a   :  { %911 = vst [vmem:[#allocation1] ss:$9 sm:$0xff] %v845_v21  ;;  %v829_v21 = vmax.f32 %v2598_v28, 0.0  ;;  %v823_v28 = vmax.f32 %v2572_v59, 0.0  ;;  %v815_v59 = vmax.f32 %v2546_v27, 0.0  ;;  %v772_v27 = vmax.f32 %v2626_v56, 0.0 }
 0x19b   :  { %v876_v12 = vpack.c.bf16 %v779_v6, %v777_v3  ;;  %v870_v55 = vpack.c.bf16 %v767_v48, %v765_v2 }
 0x19d   :  { %933 = vmatpush.bf16.msrb.mxu3 %v876_v12  ;;  %v2643_v45 = vpop.f32.mrf.mxu1 }
 0x1a0   :  { %v468_v30 = vpop.f32.mrf.mxu0 }
 0x1a1   :  { %934 = vmatpush.bf16.msrb.mxu3 %v874_v29  ;;  %v781_v6 = vmax.f32 %v468_v30, 0.0  ;;  %v839_v29 = vmax.f32 %v540_v13, 0.0 }
 0x1a5   :  { %935 = vmatpush.bf16.msrb.mxu3 %v872_v11  ;;  %v545_v11 = vpop.f32.mrf.mxu3  ;;  %v637_v19 = vpop.f32.mrf.mxu1 }
 0x1a6   :  { %v843_v12 = vmax.f32 %v545_v11, 0.0 }
 0x1a8   :  { %v470_v3 = vpop.f32.mrf.mxu0  ;;  %v908_v30 = vpack.c.bf16 %v843_v12, %v841_v63  ;;  %v827_v63 = vmax.f32 %v2594_v20, 0.0 }
 0x1a9   :  { %v783_v49 = vmax.f32 %v470_v3, 0.0  ;;  %936 = vmatpush.bf16.msrb.mxu3 %v870_v55  ;;  %v782_v55 = vmax.f32 %v637_v19, 0.0  ;;  %v2658_v3 = vld [vmem:[#allocation1 + $0x9] sm:$0xff] }
 0x1ab   :  { %v2645_v9 = vpack.c.bf16 %v783_v49, %v781_v6  ;;  %v906_v6 = vpack.c.bf16 %v839_v29, %v837_v24  ;;  %v900_v24 = vpack.c.bf16 %v827_v63, %v825_v54  ;;  %v821_v29 = vmax.f32 %v2570_v52, 0.0 }
 0x1ac   :  { %v813_v52 = vmax.f32 %v2539_v15, 0.0  ;;  %v770_v15 = vmax.f32 %v2620_v22, 0.0 }
 0x1ad   :  { %937 = vmatpush.bf16.msrb.mxu3 %v2585_v16  ;;  %v2655_v16 = vpop.f32.mrf.mxu2 }
 0x1ae   :  { %v894_v54 = vpack.c.bf16 %v815_v59, %v813_v52 }
 0x1b0   :  { %v473_v26 = vpop.f32.mrf.mxu0 }
 0x1b1   :  { %938 = vmatpush.bf16.msrb.mxu3 %v2574_v61  ;;  %v785_v48 = vmax.f32 %v473_v26, 0.0  ;;  %v833_v61 = vmax.f32 %v2615_v47, 0.0 }
 0x1b3   :  { %v904_v11 = vpack.c.bf16 %v835_v23, %v833_v61  ;;  %v817_v61 = vmax.f32 %v2553_v40, 0.0  ;;  %v819_v23 = vmax.f32 %v2560_v43, 0.0  ;;  %v774_v40 = vmax.f32 %v2633_v1, 0.0 }
 0x1b4   :  { %v776_v43 = vmax.f32 %v2637_v8, 0.0 }
 0x1b5   :  { %939 = vmatpush.bf16.msrb.mxu3 %v2563_v50  ;;  %v639_v50 = vpop.f32.mrf.mxu1  ;;  %v2669_v47 = vpop.f32.mrf.mxu2 }
 0x1b6   :  { %v784_v13 = vmax.f32 %v639_v50, 0.0 }
 0x1b8   :  { %v475_v31 = vpop.f32.mrf.mxu0  ;;  %v2665_v49 = vpack.c.bf16 %v784_v13, %v782_v55  ;;  %v896_v13 = vpack.c.bf16 %v819_v23, %v817_v61 }
 0x1b9   :  { %v787_v2 = vmax.f32 %v475_v31, 0.0  ;;  %940 = vmatpush.bf16.msrb.mxu3 %v2548_v38  ;;  %v831_v38 = vmax.f32 %v2609_v42, 0.0 }
 0x1bb   :  { %v2662_v60 = vpack.c.bf16 %v787_v2, %v785_v48  ;;  %v902_v12 = vpack.c.bf16 %v831_v38, %v829_v21  ;;  %v778_v38 = vmax.f32 %v2639_v33, 0.0 }
 0x1bc   :  { %941 = vmatmul.bf16.vlgmr.msrb.gmra.mxu3 %v2658_v3 }
 0x1bd   :  { %959 = vmatpush.bf16.msra.mxu3 %v908_v30  ;;  %v642_v19 = vpop.f32.mrf.mxu1  ;;  %v2677_v5 = vpop.f32.mrf.mxu2 }
 0x1be   :  { %v786_v48 = vmax.f32 %v642_v19, 0.0  ;;  %v2689_v19 = vld [vmem:[#allocation1 + $0x1b] sm:$0xff] }
 0x1c0   :  { %v478_v26 = vpop.f32.mrf.mxu0 }
 0x1c1   :  { %960 = vmatpush.bf16.msra.mxu3 %v906_v6  ;;  %v789_v42 = vmax.f32 %v478_v26, 0.0  ;;  %v898_v6 = vpack.c.bf16 %v823_v28, %v821_v29 }
 0x1c5   :  { %961 = vmatpush.bf16.msra.mxu3 %v904_v11  ;;  %v644_v2 = vpop.f32.mrf.mxu1  ;;  %v780_v11 = vmax.f32 %v2643_v45, 0.0 }
 0x1c6   :  { %v788_v20 = vmax.f32 %v644_v2, 0.0 }
 0x1c7   :  { %v877_v63 = vpack.c.bf16 %v780_v11, %v778_v38  ;;  %v838_v38 = vmax.f32 %v2677_v5, 0.0  ;;  %v826_v5 = vmax.f32 %v2631_v57, 0.0 }
 0x1c8   :  { %v480_v30 = vpop.f32.mrf.mxu0  ;;  %v2681_v50 = vpack.c.bf16 %v788_v20, %v786_v48  ;;  %v873_v48 = vpack.c.bf16 %v772_v27, %v770_v15 }
 0x1c9   :  { %962 = vmatpush.bf16.msra.mxu3 %v902_v12  ;;  %v791_v31 = vmax.f32 %v480_v30, 0.0  ;;  %v709_v12 = vpop.f32.mrf.mxu2 }
 0x1ca   :  { %v840_v11 = vmax.f32 %v709_v12, 0.0  ;;  %v828_v12 = vmax.f32 %v2635_v7, 0.0  ;;  %v912_v7 = vld [vmem:[#allocation1] sm:$0xff] }
 0x1cb   :  { %v2675_v55 = vpack.c.bf16 %v791_v31, %v789_v42  ;;  %v766_v42 = vmax.f32 %v2607_v41, 0.0  ;;  %v768_v31 = vmax.f32 %v2611_v34, 0.0  ;;  %928 = vmatmul.bf16.vlgmr.msrb.gmra.mxu2 %v912_v7 }
 0x1cd   :  { %963 = vmatpush.bf16.msra.mxu3 %v900_v24  ;;  %v647_v26 = vpop.f32.mrf.mxu1  ;;  %v875_v24 = vpack.c.bf16 %v776_v43, %v774_v40  ;;  %v871_v20 = vpack.c.bf16 %v768_v31, %v766_v42  ;;  %v836_v40 = vmax.f32 %v2669_v47, 0.0  ;;  %v907_v43 = vpack.c.bf16 %v840_v11, %v838_v38  ;;  %v3098_v11 = vld [vmem:[#allocation2_spill] sm:$0xff] }
 0x1ce   :  { %v790_v28 = vmax.f32 %v647_v26, 0.0  ;;  %v822_v47 = vmax.f32 %v2613_v46, 0.0 }
 0x1d0   :  { %v483_v21 = vpop.f32.mrf.mxu0 }
 0x1d1   :  { %964 = vmatpush.bf16.msra.mxu3 %v898_v6  ;;  %v793_v45 = vmax.f32 %v483_v21, 0.0  ;;  %v712_v56 = vpop.f32.mrf.mxu2 }
 0x1d2   :  { %v842_v34 = vmax.f32 %v712_v56, 0.0 }
 0x1d5   :  { %965 = vmatpush.bf16.msra.mxu3 %v896_v13  ;;  %v649_v1 = vpop.f32.mrf.mxu1 }
 0x1d6   :  { %v792_v8 = vmax.f32 %v649_v1, 0.0 }
 0x1d8   :  { %v485_v33 = vpop.f32.mrf.mxu0  ;;  %v2698_v22 = vpack.c.bf16 %v792_v8, %v790_v28 }
 0x1d9   :  { %966 = vmatpush.bf16.msra.mxu3 %v894_v54  ;;  %v795_v29 = vmax.f32 %v485_v33, 0.0  ;;  %v714_v6 = vpop.f32.mrf.mxu2 }
 0x1da   :  { %v844_v13 = vmax.f32 %v714_v6, 0.0 }
 0x1db   :  { %v2694_v30 = vpack.c.bf16 %v795_v29, %v793_v45  ;;  %v814_v45 = vmax.f32 %v2581_v4, 0.0  ;;  %v816_v29 = vmax.f32 %v2589_v18, 0.0 }
 0x1dc   :  { %967 = vmatmul.bf16.vlgmr.msra.gmra.mxu3 %v2689_v19  ;;  %v909_v26 = vpack.c.bf16 %v844_v13, %v842_v34  ;;  %v914_v34 = vld [vmem:[#allocation1 + $0x12] sm:$0xff] }
 0x1dd   :  { %985 = vmatpush.bf16.msrb.mxu3 %v877_v63  ;;  %v652_v61 = vpop.f32.mrf.mxu1  ;;  %v832_v63 = vmax.f32 %v2648_v36, 0.0  ;;  %v820_v36 = vmax.f32 %v2605_v37, 0.0  ;;  %v895_v46 = vpack.c.bf16 %v816_v29, %v814_v45 }
 0x1de   :  { %v794_v52 = vmax.f32 %v652_v61, 0.0 }
 0x1e0   :  { %v2700_v2 = vpop.f32.mrf.mxu0 }
 0x1e1   :  { %986 = vmatpush.bf16.msrb.mxu3 %v875_v24 }
 0x1e5   :  { %987 = vmatpush.bf16.msrb.mxu3 %v873_v48  ;;  %v654_v59 = vpop.f32.mrf.mxu1 }
 0x1e6   :  { %v796_v41 = vmax.f32 %v654_v59, 0.0 }
 0x1e8   :  { %v2703_v23 = vpop.f32.mrf.mxu0  ;;  %v2706_v21 = vpack.c.bf16 %v796_v41, %v794_v52  ;;  %v797_v52 = vmax.f32 %v2700_v2, 0.0 }
 0x1e9   :  { %988 = vmatpush.bf16.msrb.mxu3 %v871_v20  ;;  %v799_v61 = vmax.f32 %v2703_v23, 0.0 }
 0x1ed   :  { %989 = vmatpush.bf16.msrb.mxu3 %v2600_v32  ;;  %v834_v32 = vmax.f32 %v2655_v16, 0.0  ;;  %v901_v16 = vpack.c.bf16 %v828_v12, %v826_v5  ;;  %v2722_v57 = vpop.f32.mrf.mxu1  ;;  %v1947_v12 = vld [vmem:[%s3090_s3 + $0x60] sm:$0xf] }
 0x1f0   :  { %v493_v54 = vpop.f32.mrf.mxu0 }
 0x1f1   :  { %990 = vmatpush.bf16.msrb.mxu3 %v2587_v17  ;;  %v830_v17 = vmax.f32 %v2641_v58, 0.0  ;;  %v818_v58 = vmax.f32 %v2596_v25, 0.0  ;;  %v801_v18 = vmax.f32 %v493_v54, 0.0 }
 0x1f3   :  { %v897_v28 = vpack.c.bf16 %v820_v36, %v818_v58  ;;  %v2227_v58 = vld [vmem:[%s3090_s3 + $0x38] sm:$0xf0] }
 0x1f5   :  { %991 = vmatpush.bf16.msrb.mxu3 %v2576_v0  ;;  %v905_v0 = vpack.c.bf16 %v836_v40, %v834_v32  ;;  %v659_v1 = vpop.f32.mrf.mxu1  ;;  %v1983_v32 = vld [vmem:[%s3090_s3 + $0xa8] sm:$0xf]  ;;  %v2242_v40 = vld [vmem:[%s3090_s3 + $0xb0] sm:$0xf0] }
 0x1f8   :  { %v495_v15 = vpop.f32.mrf.mxu0 }
 0x1f9   :  { %992 = vmatpush.bf16.msrb.mxu3 %v2565_v51  ;;  %v903_v51 = vpack.c.bf16 %v832_v63, %v830_v17  ;;  %v803_v4 = vmax.f32 %v495_v15, 0.0  ;;  %v1984_v17 = vor.u32 %v2242_v40, %v1983_v32  ;;  %v1971_v63 = vld [vmem:[%s3090_s3 + $0x90] sm:$0xf] }
 0x1fb   :  { %v888_v6 = vpack.c.bf16 %v803_v4, %v801_v18  ;;  %v2019_v4 = vld [vmem:[%s3090_s3 + $0xf0] sm:$0xf] }
 0x1fc   :  { %993 = vmatmul.bf16.vlgmr.msrb.gmra.mxu3 %v2658_v3  ;;  %v824_v3 = vmax.f32 %v2622_v10, 0.0 }
 0x1fd   :  { %1011 = vmatpush.bf16.msra.mxu3 %v909_v26  ;;  %v662_v48 = vpop.f32.mrf.mxu1 }
 0x1fe   :  { %v899_v33 = vpack.c.bf16 %v824_v3, %v822_v47  ;;  %v1923_v3 = vld [vmem:[%s3090_s3 + $0x30] sm:$0xf] }
 0x1ff   :  { %v1924_v36 = vor.u32 %v2227_v58, %v1923_v3  ;;  %v2232_v58 = vld [vmem:[%s3090_s3 + $0x64] sm:$0xf] }
 0x200   :  { %v498_v27 = vpop.f32.mrf.mxu0 }
 0x201   :  { %1012 = vmatpush.bf16.msra.mxu3 %v907_v43  ;;  %v805_v56 = vmax.f32 %v498_v27, 0.0  ;;  %v2230_v27 = vld [vmem:[%s3090_s3 + $0x50] sm:$0xf0] }
 0x205   :  { %1013 = vmatpush.bf16.msra.mxu3 %v905_v0  ;;  %v664_v59 = vpop.f32.mrf.mxu1  ;;  %v1959_v0 = vld [vmem:[%s3090_s3 + $0x78] sm:$0xf] }
 0x208   :  { %v500_v24 = vpop.f32.mrf.mxu0 }
 0x209   :  { %1014 = vmatpush.bf16.msra.mxu3 %v903_v51  ;;  %v807_v42 = vmax.f32 %v500_v24, 0.0 }
 0x20b   :  { %v890_v20 = vpack.c.bf16 %v807_v42, %v805_v56  ;;  %v2254_v42 = vld [vmem:[%s3090_s3 + $0x110] sm:$0xf0]  ;;  %v2033_v56 = vld [vmem:[%s3090_s3 + $0x114] sm:$0xf0] }
 0x20d   :  { %1015 = vmatpush.bf16.msra.mxu3 %v901_v16  ;;  %v667_v41 = vpop.f32.mrf.mxu1  ;;  %v1935_v16 = vld [vmem:[%s3090_s3 + $0x48] sm:$0xf] }
 0x20e   :  { %v806_v23 = vmax.f32 %v667_v41, 0.0  ;;  %v1936_v47 = vor.u32 %v2230_v27, %v1935_v16  ;;  %v1967_v16 = vld [vmem:[%s3090_s3 + $0x80] sm:$0xf] }
 0x210   :  { %v503_v10 = vpop.f32.mrf.mxu0 }
 0x211   :  { %1016 = vmatpush.bf16.msra.mxu3 %v899_v33  ;;  %v809_v37 = vmax.f32 %v503_v10, 0.0 }
 0x215   :  { %1017 = vmatpush.bf16.msra.mxu3 %v897_v28  ;;  %v669_v13 = vpop.f32.mrf.mxu1  ;;  %v1899_v28 = vld [vmem:[%s3090_s3] sm:$0xf] }
 0x216   :  { %v808_v38 = vmax.f32 %v669_v13, 0.0 }
 0x218   :  { %v505_v25 = vpop.f32.mrf.mxu0  ;;  %v891_v26 = vpack.c.bf16 %v808_v38, %v806_v23  ;;  %v2009_v23 = vld [vmem:[%s3090_s3 + $0xe4] sm:$0xf0]  ;;  %v1995_v38 = vld [vmem:[%s3090_s3 + $0xc0] sm:$0xf] }
 0x219   :  { %1018 = vmatpush.bf16.msra.mxu3 %v895_v46  ;;  %v811_v8 = vmax.f32 %v505_v25, 0.0  ;;  %v2221_v46 = vld [vmem:[%s3090_s3 + $0x8] sm:$0xf0] }
 0x21a   :  { %v1900_v10 = vor.u32 %v2221_v46, %v1899_v28  ;;  %v1937_v28 = vld [vmem:[%s3090_s3 + $0x54] sm:$0xf0] }
 0x21b   :  { %v892_v31 = vpack.c.bf16 %v811_v8, %v809_v37  ;;  %v2031_v8 = vld [vmem:[%s3090_s3 + $0x108] sm:$0xf] }
 0x21c   :  { %1019 = vmatmul.bf16.vlgmr.msra.gmra.mxu3 %v2689_v19  ;;  %v886_v19 = vpack.c.bf16 %v799_v61, %v797_v52  ;;  %v2021_v52 = vld [vmem:[%s3090_s3 + $0xfc] sm:$0xf0] }
 0x21d   :  { %946 = vmatpush.bf16.msra.mxu2 %v892_v31  ;;  %v672_v2 = vpop.f32.mrf.mxu1  ;;  %v2253_v31 = vld [vmem:[%s3090_s3 + $0x10c] sm:$0xf] }
 0x21e   :  { %v2036_v61 = vor.u32 %v2253_v31, %v2033_v56  ;;  %v1931_v31 = vld [vmem:[%s3090_s3 + $0x38] sm:$0xf]  ;;  %v2228_v56 = vld [vmem:[%s3090_s3 + $0x40] sm:$0xf0] }
 0x221   :  { %947 = vmatpush.bf16.msra.mxu2 %v890_v20  ;;  %v2251_v20 = vld [vmem:[%s3090_s3 + $0xf8] sm:$0xf0] }
 0x225   :  { %948 = vmatpush.bf16.msra.mxu2 %v888_v6  ;;  %v2250_v6 = vld [vmem:[%s3090_s3 + $0xf4] sm:$0xf] }
 0x226   :  { %v2024_v41 = vor.u32 %v2250_v6, %v2021_v52  ;;  %v2225_v6 = vld [vmem:[%s3090_s3 + $0x28] sm:$0xf0] }
 0x229   :  { %949 = vmatpush.bf16.msra.mxu2 %v886_v19  ;;  %v2020_v19 = vor.u32 %v2251_v20, %v2019_v4  ;;  %v2223_v4 = vld [vmem:[%s3090_s3 + $0x1c] sm:$0xf]  ;;  %v1913_v20 = vld [vmem:[%s3090_s3 + $0x24] sm:$0xf0] }
 0x22d   :  { %950 = vmatpush.bf16.msra.mxu2 %v2694_v30  ;;  %v674_v30 = vpop.f32.mrf.mxu1 }
 0x231   :  { %951 = vmatpush.bf16.msra.mxu2 %v2675_v55  ;;  %v812_v55 = vmax.f32 %v674_v30, 0.0  ;;  %v2007_v30 = vld [vmem:[%s3090_s3 + $0xd8] sm:$0xf] }
 0x235   :  { %952 = vmatpush.bf16.msra.mxu2 %v2662_v60  ;;  %v810_v60 = vmax.f32 %v672_v2, 0.0 }
 0x239   :  { %953 = vmatpush.bf16.msra.mxu2 %v2645_v9  ;;  %v3097_v9 = vld [vmem:[#allocation3_spill] sm:$0xff] }
 0x23c   :  { %954 = vmatmul.bf16.vlgmr.msra.gmra.mxu2 %v914_v34 }
 0x23d   :  { %972 = vmatpush.bf16.msrb.mxu2 %v2551_v39  ;;  %v893_v39 = vpack.c.bf16 %v812_v55, %v810_v60  ;;  %v2248_v60 = vld [vmem:[%s3090_s3 + $0xe0] sm:$0xf0]  ;;  %v2247_v55 = vld [vmem:[%s3090_s3 + $0xdc] sm:$0xf] }
 0x23f   :  { %v942_v43 = vpop.f32.mrf.mxu3 }
 0x241   :  { %973 = vmatpush.bf16.msrb.mxu2 %v2537_v14  ;;  %v802_v14 = vmax.f32 %v662_v48, 0.0  ;;  %v2032_v48 = vor.u32 %v2254_v42, %v2031_v8  ;;  %v2226_v8 = vld [vmem:[%s3090_s3 + $0x34] sm:$0xf]  ;;  %v1925_v42 = vld [vmem:[%s3090_s3 + $0x3c] sm:$0xf0] }
 0x243   :  { %1295 = vmatpush.bf16.msrb.mxu3 %v2032_v48  ;;  %v1928_v48 = vor.u32 %v2226_v8, %v1925_v42 }
 0x245   :  { %974 = vmatpush.bf16.msrb.mxu2 %v2532_v62  ;;  %v804_v62 = vmax.f32 %v664_v59, 0.0 }
 0x247   :  { %v889_v54 = vpack.c.bf16 %v804_v62, %v802_v14  ;;  %v944_v15 = vpop.f32.mrf.mxu3  ;;  %1296 = vmatpush.bf16.msrb.mxu3 %v2020_v19  ;;  %v2244_v14 = vld [vmem:[%s3090_s3 + $0xc4] sm:$0xf]  ;;  %v1997_v62 = vld [vmem:[%s3090_s3 + $0xcc] sm:$0xf0] }
 0x248   :  { %v2000_v40 = vor.u32 %v2244_v14, %v1997_v62 }
 0x249   :  { %975 = vmatpush.bf16.msrb.mxu2 %v2524_v53  ;;  %v800_v53 = vmax.f32 %v659_v1, 0.0 }
 0x24d   :  { %976 = vmatpush.bf16.msrb.mxu2 %v2516_v44  ;;  %v798_v44 = vmax.f32 %v2722_v57, 0.0  ;;  %v1911_v57 = vld [vmem:[%s3090_s3 + $0x18] sm:$0xf] }
 0x24e   :  { %v929_v33 = vpop.f32.mrf.mxu2 }
 0x24f   :  { %v943_v25 = vadd.f32 %v942_v43, %v929_v33  ;;  %v1955_v33 = vld [vmem:[%s3090_s3 + $0x68] sm:$0xf] }
 0x251   :  { %977 = vmatpush.bf16.msrb.mxu2 %v2504_v35  ;;  %v887_v35 = vpack.c.bf16 %v800_v53, %v798_v44  ;;  %v1985_v53 = vld [vmem:[%s3090_s3 + $0xb4] sm:$0xf0] }
 0x255   :  { %978 = vmatpush.bf16.msrb.mxu2 %v3097_v9  ;;  %v2008_v9 = vor.u32 %v2248_v60, %v2007_v30  ;;  %v2222_v30 = vld [vmem:[%s3090_s3 + $0x10] sm:$0xf0] }
 0x256   :  { %v931_v24 = vpop.f32.mrf.mxu2 }
 0x257   :  { %1297 = vmatpush.bf16.msrb.mxu3 %v2008_v9 }
 0x259   :  { %979 = vmatpush.bf16.msrb.mxu2 %v3098_v11  ;;  %v2012_v11 = vor.u32 %v2247_v55, %v2009_v23 }
 0x25c   :  { %980 = vmatmul.bf16.vlgmr.msrb.gmra.mxu2 %v912_v7  ;;  %v2224_v7 = vld [vmem:[%s3090_s3 + $0x20] sm:$0xf0] }
 0x25d   :  { %998 = vmatpush.bf16.msra.mxu2 %v893_v39  ;;  %v1912_v45 = vor.u32 %v2224_v7, %v1911_v57  ;;  %v2245_v39 = vld [vmem:[%s3090_s3 + $0xc8] sm:$0xf0]  ;;  %v2234_v57 = vld [vmem:[%s3090_s3 + $0x70] sm:$0xf0] }
 0x25e   :  { %v1996_v32 = vor.u32 %v2245_v39, %v1995_v38  ;;  %v2039_v39 = vld [vmem:[%s3090_s3 + $0x110] sm:$0xf] }
 0x25f   :  { %v968_v29 = vpop.f32.mrf.mxu3 }
 0x260   :  { %1298 = vmatpush.bf16.msrb.mxu3 %v1996_v32  ;;  %v2249_v32 = vld [vmem:[%s3090_s3 + $0xe8] sm:$0xf0] }
 0x261   :  { %999 = vmatpush.bf16.msra.mxu2 %v891_v26  ;;  %v2241_v26 = vld [vmem:[%s3090_s3 + $0xac] sm:$0xf] }
 0x262   :  { %v1988_v43 = vor.u32 %v2241_v26, %v1985_v53 }
 0x264   :  { %1304 = vmatpush.bf16.msra.mxu3 %v1988_v43  ;;  %v2003_v43 = vld [vmem:[%s3090_s3 + $0xc8] sm:$0xf] }
 0x265   :  { %1000 = vmatpush.bf16.msra.mxu2 %v889_v54  ;;  %v1991_v54 = vld [vmem:[%s3090_s3 + $0xb0] sm:$0xf] }
 0x267   :  { %v970_v1 = vpop.f32.mrf.mxu3 }
 0x268   :  { %v2231_v1 = vld [vmem:[%s3090_s3 + $0x58] sm:$0xf0] }
 0x269   :  { %1001 = vmatpush.bf16.msra.mxu2 %v887_v35  ;;  %v2243_v35 = vld [vmem:[%s3090_s3 + $0xb8] sm:$0xf0] }
 0x26d   :  { %1002 = vmatpush.bf16.msra.mxu2 %v2706_v21 }
 0x271   :  { %1003 = vmatpush.bf16.msra.mxu2 %v2698_v22  ;;  %v2239_v22 = vld [vmem:[%s3090_s3 + $0x98] sm:$0xf0] }
 0x272   :  { %v1972_v21 = vor.u32 %v2239_v22, %v1971_v63  ;;  %v2238_v63 = vld [vmem:[%s3090_s3 + $0x94] sm:$0xf]  ;;  %v1973_v22 = vld [vmem:[%s3090_s3 + $0x9c] sm:$0xf0] }
 0x273   :  { %v1976_v15 = vor.u32 %v2238_v63, %v1973_v22  ;;  %v2263_v22 = vld [vmem:[%s3091_s5 + $0x38] sm:$0xff] }
 0x275   :  { %1004 = vmatpush.bf16.msra.mxu2 %v2681_v50  ;;  %v2236_v50 = vld [vmem:[%s3090_s3 + $0x80] sm:$0xf0]  ;;  %1305 = vmatpush.bf16.msra.mxu3 %v1976_v15  ;;  %v2262_v15 = vld [vmem:[%s3091_s5 + $0x30] sm:$0xff] }
 0x276   :  { %v1960_v5 = vor.u32 %v2236_v50, %v1959_v0  ;;  %v2240_v0 = vld [vmem:[%s3090_s3 + $0xa0] sm:$0xf0] }
 0x279   :  { %1005 = vmatpush.bf16.msra.mxu2 %v2665_v49  ;;  %v2233_v49 = vld [vmem:[%s3090_s3 + $0x68] sm:$0xf0] }
 0x27a   :  { %v1948_v51 = vor.u32 %v2233_v49, %v1947_v12  ;;  %v2235_v49 = vld [vmem:[%s3090_s3 + $0x7c] sm:$0xf] }
 0x27c   :  { %1006 = vmatmul.bf16.vlgmr.msra.gmra.mxu2 %v914_v34 }
 0x27d   :  { %1278 = vmatpush.bf16.msrb.mxu2 %v1984_v17  ;;  %v1992_v17 = vor.u32 %v2243_v35, %v1991_v54  ;;  %v2015_v35 = vld [vmem:[%s3090_s3 + $0xe0] sm:$0xf] }
 0x27f   :  { %v2794_v37 = vpop.f32.mrf.mxu3 }
 0x281   :  { %1279 = vmatpush.bf16.msrb.mxu2 %v1972_v21  ;;  %v1979_v21 = vld [vmem:[%s3090_s3 + $0x98] sm:$0xf] }
 0x285   :  { %1280 = vmatpush.bf16.msrb.mxu2 %v1960_v5  ;;  %v1980_v5 = vor.u32 %v2240_v0, %v1979_v21 }
 0x287   :  { %v996_v2 = vpop.f32.mrf.mxu3 }
 0x288   :  { %v1907_v2 = vld [vmem:[%s3090_s3 + $0x8] sm:$0xf] }
 0x289   :  { %1281 = vmatpush.bf16.msrb.mxu2 %v1948_v51  ;;  %v1961_v51 = vld [vmem:[%s3090_s3 + $0x84] sm:$0xf0]  ;;  %v1908_v55 = vor.u32 %v2222_v30, %v1907_v2 }
 0x28a   :  { %v1964_v27 = vor.u32 %v2235_v49, %v1961_v51  ;;  %v2260_v49 = vld [vmem:[%s3091_s5 + $0x20] sm:$0xff] }
 0x28b   :  { %v2268_v51 = vld [vmem:[%s3091_s5 + $0x60] sm:$0xff] }
 0x28c   :  { %1306 = vmatpush.bf16.msra.mxu3 %v1964_v27  ;;  %v2267_v27 = vld [vmem:[%s3091_s5 + $0x58] sm:$0xff] }
 0x28d   :  { %1282 = vmatpush.bf16.msrb.mxu2 %v1936_v47  ;;  %v2237_v47 = vld [vmem:[%s3090_s3 + $0x88] sm:$0xf0] }
 0x28e   :  { %v1968_v3 = vor.u32 %v2237_v47, %v1967_v16  ;;  %v2259_v16 = vld [vmem:[%s3091_s5 + $0x18] sm:$0xff]  ;;  %v2258_v47 = vld [vmem:[%s3091_s5 + $0x10] sm:$0xff] }
 0x291   :  { %1283 = vmatpush.bf16.msrb.mxu2 %v1924_v36  ;;  %v1949_v36 = vld [vmem:[%s3090_s3 + $0x6c] sm:$0xf0] }
 0x292   :  { %v1952_v24 = vor.u32 %v2232_v58, %v1949_v36  ;;  %v2257_v58 = vld [vmem:[%s3091_s5 + $0x8] sm:$0xff] }
 0x293   :  { %v2265_v36 = vld [vmem:[%s3091_s5 + $0x48] sm:$0xff] }
 0x294   :  { %1307 = vmatpush.bf16.msra.mxu3 %v1952_v24  ;;  %v2279_v24 = vld [vmem:[%s3091_s5 + $0xb8] sm:$0xff] }
 0x295   :  { %1284 = vmatpush.bf16.msrb.mxu2 %v1912_v45  ;;  %v1956_v45 = vor.u32 %v2234_v57, %v1955_v33  ;;  %v2256_v33 = vld [vmem:[%s3091_s5] sm:$0xff] }
 0x296   :  { %v2264_v57 = vld [vmem:[%s3091_s5 + $0x40] sm:$0xff] }
 0x299   :  { %1285 = vmatpush.bf16.msrb.mxu2 %v1900_v10  ;;  %v1943_v10 = vld [vmem:[%s3090_s3 + $0x50] sm:$0xf] }
 0x29d   :  { %1321 = vmatpush.bf16.msra.mxu2 %v2036_v61  ;;  %v1919_v61 = vld [vmem:[%s3090_s3 + $0x20] sm:$0xf] }
 0x29e   :  { %v1920_v19 = vor.u32 %v2225_v6, %v1919_v61  ;;  %v2273_v6 = vld [vmem:[%s3091_s5 + $0x88] sm:$0xff] }
 0x29f   :  { %v2871_v50 = vpop.f32.mrf.mxu3 }
 0x2a1   :  { %1322 = vmatpush.bf16.msra.mxu2 %v2024_v41  ;;  %v2220_v41 = vld [vmem:[%s3090_s3 + $0x4] sm:$0xf] }
 0x2a5   :  { %1323 = vmatpush.bf16.msra.mxu2 %v2012_v11  ;;  %v2255_v11 = vld [vmem:[%s3090_s3 + $0x118] sm:$0xf0] }
 0x2a6   :  { %v2040_v62 = vor.u32 %v2255_v11, %v2039_v39 }
 0x2a7   :  { %v1022_v12 = vpop.f32.mrf.mxu3 }
 0x2a8   :  { %v2269_v12 = vld [vmem:[%s3091_s5 + $0x68] sm:$0xff] }
 0x2a9   :  { %1324 = vmatpush.bf16.msra.mxu2 %v2000_v40  ;;  %v2016_v40 = vor.u32 %v2249_v32, %v2015_v35 }
 0x2bf   :  { %v955_v18 = vpop.f32.mrf.mxu2 }
 0x2c0   :  { %v956_v59 = vadd.f32 %v955_v18, %v943_v25  ;;  %v1944_v25 = vor.u32 %v2231_v1, %v1943_v10  ;;  %v1932_v18 = vor.u32 %v2228_v56, %v1931_v31  ;;  %v2277_v10 = vld [vmem:[%s3091_s5 + $0xa8] sm:$0xff]  ;;  %v2284_v31 = vld [vmem:[%s3091_s5 + $0xe0] sm:$0xff]  ;;  %v2283_v56 = vld [vmem:[%s3091_s5 + $0xd8] sm:$0xff] }
 0x2c1   :  { %v2285_v1 = vld [vmem:[%s3091_s5 + $0xe8] sm:$0xff] }
 0x2c2   :  { %v969_v34 = vadd.f32 %v968_v29, %v956_v59  ;;  %v2229_v29 = vld [vmem:[%s3090_s3 + $0x4c] sm:$0xf]  ;;  %v1916_v59 = vor.u32 %v2223_v4, %v1913_v20  ;;  %v2274_v4 = vld [vmem:[%s3091_s5 + $0x90] sm:$0xff] }
 0x2c3   :  { %v1940_v46 = vor.u32 %v2229_v29, %v1937_v28  ;;  %v2282_v20 = vld [vmem:[%s3091_s5 + $0xd0] sm:$0xff] }
 0x2c4   :  { %v2820_v13 = vpack.c.bf16 %v969_v34, %v969_v34  ;;  %v1901_v34 = vld [vmem:[%s3090_s3 + $0xc] sm:$0xf0] }
 0x2c5   :  { %1308 = vmatpush.bf16.msra.mxu3 %v1940_v46  ;;  %v1904_v60 = vor.u32 %v2220_v41, %v1901_v34  ;;  %v2286_v46 = vld [vmem:[%s3091_s5 + $0xf0] sm:$0xff]  ;;  %v2272_v41 = vld [vmem:[%s3091_s5 + $0x80] sm:$0xff] }
 0x2c6   :  { %1286 = vmatmul.bf16.vlgmr.msrb.gmra.mxu2 %v2820_v13  ;;  %v2280_v34 = vld [vmem:[%s3091_s5 + $0xc0] sm:$0xff] }
 0x2c7   :  { %v957_v44 = vpop.f32.mrf.mxu2  ;;  %1330 = vmatpush.bf16.msrb.mxu2 %v1992_v17  ;;  %v2246_v17 = vld [vmem:[%s3090_s3 + $0xd0] sm:$0xf0] }
 0x2c8   :  { %v2027_v44 = vld [vmem:[%s3090_s3 + $0xf8] sm:$0xf]  ;;  %v2004_v63 = vor.u32 %v2246_v17, %v2003_v43 }
 0x2c9   :  { %1309 = vmatpush.bf16.msra.mxu3 %v1928_v48  ;;  %v2275_v48 = vld [vmem:[%s3091_s5 + $0x98] sm:$0xff] }
 0x2cb   :  { %1331 = vmatpush.bf16.msrb.mxu2 %v1980_v5  ;;  %v2261_v5 = vld [vmem:[%s3091_s5 + $0x28] sm:$0xff] }
 0x2cd   :  { %1310 = vmatpush.bf16.msra.mxu3 %v1916_v59  ;;  %v1074_v59 = vld [vmem:[%s3093_s4] sm:$0x7] }
 0x2cf   :  { %1332 = vmatpush.bf16.msrb.mxu2 %v1968_v3  ;;  %v2266_v3 = vld [vmem:[%s3091_s5 + $0x50] sm:$0xff] }
 0x2d1   :  { %1311 = vmatpush.bf16.msra.mxu3 %v1904_v60 }
 0x2d3   :  { %1333 = vmatpush.bf16.msrb.mxu2 %v1956_v45  ;;  %v2278_v45 = vld [vmem:[%s3091_s5 + $0xb0] sm:$0xff] }
 0x2d7   :  { %1334 = vmatpush.bf16.msrb.mxu2 %v1944_v25  ;;  %v2276_v25 = vld [vmem:[%s3091_s5 + $0xa0] sm:$0xff] }
 0x2db   :  { %1335 = vmatpush.bf16.msrb.mxu2 %v1932_v18 }
 0x2df   :  { %v981_v7 = vpop.f32.mrf.mxu2  ;;  %1336 = vmatpush.bf16.msrb.mxu2 %v1920_v19  ;;  %v1077_v19 = vperm.slane %v1074_v59, 1 }
 0x2e0   :  { %v995_v9 = vadd.f32 %v2794_v37, %v981_v7  ;;  %v2252_v37 = vld [vmem:[%s3090_s3 + $0x100] sm:$0xf0]  ;;  %v2287_v7 = vld [vmem:[%s3091_s5 + $0xf8] sm:$0xff] }
 0x2e1   :  { %v2028_v54 = vor.u32 %v2252_v37, %v2027_v44 }
 0x2e3   :  { %1337 = vmatpush.bf16.msrb.mxu2 %v1908_v55  ;;  %v1078_v55 = vperm.slane %v1074_v59, 2 }
 0x2e7   :  { %v983_v52 = vpop.f32.mrf.mxu2 }
 0x2e8   :  { %v2281_v52 = vld [vmem:[%s3091_s5 + $0xc8] sm:$0xff] }
 0x2ff   :  { %v1007_v23 = vpop.f32.mrf.mxu2 }
 0x300   :  { %v1008_v38 = vadd.f32 %v1007_v23, %v995_v9  ;;  %v1076_v9 = vperm.slane %v1074_v59, 0 }
 0x302   :  { %v1021_v14 = vadd.f32 %v2871_v50, %v1008_v38  ;;  %v2271_v50 = vld [vmem:[%s3091_s5 + $0x78] sm:$0xff] }
 0x304   :  { %v1025_v26 = vpack.c.bf16 %v1021_v14, %v1021_v14 }
 0x306   :  { %2041 = vmatmul.msk.bf16.vlgmr.msrb.gmra.mxu3 %vm1274_vm0, %v1025_v26  ;;  %2042 = vmatmul.msk.bf16.vlgmr.msra.gmra.mxu2 %vm1274_vm0, %v1025_v26 }
 0x307   :  { %v1009_v53 = vpop.f32.mrf.mxu2  ;;  %1347 = vmatpush.bf16.msrb.mxu3 %v2040_v62  ;;  %1661 = vmatpush.bf16.msra.mxu2 %v2271_v50 }
 0x30b   :  { %1348 = vmatpush.bf16.msrb.mxu3 %v2028_v54 }
 0x30f   :  { %1349 = vmatpush.bf16.msrb.mxu3 %v2016_v40 }
 0x313   :  { %1350 = vmatpush.bf16.msrb.mxu3 %v2004_v63 }
 0x316   :  { %1312 = vmatmul.bf16.vlgmr.msra.gmra.mxu3 %v2820_v13  ;;  %1338 = vmatmul.bf16.vlgmr.msrb.gmra.mxu2 %v2820_v13  ;;  %v2270_v13 = vld [vmem:[%s3091_s5 + $0x70] sm:$0xff] }
 0x317   :  { %1648 = vmatpush.bf16.msra.mxu3 %v2263_v22  ;;  %1662 = vmatpush.bf16.msra.mxu2 %v2270_v13 }
 0x31b   :  { %1649 = vmatpush.bf16.msra.mxu3 %v2262_v15  ;;  %1663 = vmatpush.bf16.msra.mxu2 %v2269_v12 }
 0x31f   :  { %1650 = vmatpush.bf16.msra.mxu3 %v2261_v5  ;;  %1664 = vmatpush.bf16.msra.mxu2 %v2268_v51 }
 0x323   :  { %1651 = vmatpush.bf16.msra.mxu3 %v2260_v49  ;;  %1665 = vmatpush.bf16.msra.mxu2 %v2267_v27  ;;  %v2304_v27 = vld [vmem:[%s3092_s6] ss:$0 sm:$0xff] }
 0x326   :  { %2043 = vmatmul.msk.bf16.vlgmr.msrb.gmra.mxu3 %vm1274_vm0, %v1025_v26 }
 0x327   :  { %1652 = vmatpush.bf16.msra.mxu3 %v2259_v16  ;;  %1666 = vmatpush.bf16.msra.mxu2 %v2266_v3 }
 0x32b   :  { %1653 = vmatpush.bf16.msra.mxu3 %v2258_v47  ;;  %1667 = vmatpush.bf16.msra.mxu2 %v2265_v36 }
 0x32f   :  { %1654 = vmatpush.bf16.msra.mxu3 %v2257_v58  ;;  %1668 = vmatpush.bf16.msra.mxu2 %v2264_v57 }
 0x333   :  { %1655 = vmatpush.bf16.msra.mxu3 %v2256_v33  ;;  %1687 = vmatpush.bf16.msrb.mxu2 %v2287_v7 }
 0x337   :  { %1674 = vmatpush.bf16.msrb.mxu3 %v2279_v24  ;;  %1688 = vmatpush.bf16.msrb.mxu2 %v2286_v46 }
 0x33b   :  { %1675 = vmatpush.bf16.msrb.mxu3 %v2278_v45  ;;  %1689 = vmatpush.bf16.msrb.mxu2 %v2285_v1 }
 0x33f   :  { %1676 = vmatpush.bf16.msrb.mxu3 %v2277_v10  ;;  %1690 = vmatpush.bf16.msrb.mxu2 %v2284_v31 }
 0x343   :  { %1677 = vmatpush.bf16.msrb.mxu3 %v2276_v25  ;;  %1691 = vmatpush.bf16.msrb.mxu2 %v2283_v56 }
 0x347   :  { %1678 = vmatpush.bf16.msrb.mxu3 %v2275_v48  ;;  %1692 = vmatpush.bf16.msrb.mxu2 %v2282_v20 }
 0x349   :  { %v2979_v21 = vpop.f32.mrf.mxu2 }
 0x34a   :  { %v1288_v39 = vadd.f32 %v2979_v21, %v1076_v9 }
 0x34b   :  { %1679 = vmatpush.bf16.msrb.mxu3 %v2274_v4  ;;  %1693 = vmatpush.bf16.msrb.mxu2 %v2281_v52 }
 0x34f   :  { %1680 = vmatpush.bf16.msrb.mxu3 %v2273_v6  ;;  %1694 = vmatpush.bf16.msrb.mxu2 %v2280_v34 }
 0x351   :  { %v1289_v0 = vpop.f32.mrf.mxu2 }
 0x353   :  { %1681 = vmatpush.bf16.msrb.mxu3 %v2272_v41 }
 0x389   :  { %v1300_v29 = vpop.f32.mrf.mxu3  ;;  %v1326_v28 = vpop.f32.mrf.mxu2 }
 0x38a   :  { %v1301_v26 = vadd.f32 %v1300_v29, %v1288_v39 }
 0x391   :  { %v1302_v8 = vpop.f32.mrf.mxu3  ;;  %v1328_v42 = vpop.f32.mrf.mxu2 }
 0x399   :  { %v1313_v18 = vpop.f32.mrf.mxu3  ;;  %v1339_v61 = vpop.f32.mrf.mxu2 }
 0x39a   :  { %v1314_v2 = vadd.f32 %v1313_v18, %v1077_v19  ;;  %v1340_v38 = vadd.f32 %v1339_v61, %v1078_v55 }
 0x39c   :  { %v1327_v23 = vadd.f32 %v1326_v28, %v1314_v2 }
 0x39e   :  { %v1362_v11 = vrot.slane %v1327_v23, 6  ;;  %v1356_v21 = vmax.f32 %v1301_v26, %v1327_v23 }
 0x3a0   :  { %v1368_v37 = vsel %vm1367_vm1, %v1301_v26, %v1362_v11 }
 0x3a1   :  { %v1315_v30 = vpop.f32.mrf.mxu3  ;;  %v1341_v60 = vpop.f32.mrf.mxu2 }
 0x3a9   :  { %v1352_v14 = vpop.f32.mrf.mxu3 }
 0x3aa   :  { %v1353_v62 = vadd.f32 %v1352_v14, %v1340_v38 }
 0x3ac   :  { %v1365_v44 = vrot.slane %v1353_v62, 4  ;;  %v1357_v0 = vmax.f32 %v1356_v21, %v1353_v62 }
 0x3ae   :  { %v1370_v53 = vsel %vm1369_vm2, %v1368_v37, %v1365_v44  ;;  %v1359_v15 = vmul.f32 0.01, %v1357_v0  ;;  %vm1358_vm4 = vcmp.ge.f32.partialorder %v1357_v0, 0.0 }
 0x3af   :  { %v1372_v54 = vrot.slane %v1370_v53, 1  ;;  %v1374_v35 = vrot.slane %v1370_v53, 2 }
 0x3b0   :  { %v1360_v5 = vsel %vm1358_vm4, %v1357_v0, %v1359_v15 }
 0x3b1   :  { %v1376_v32 = vrot.slane %v1372_v54, 2  ;;  %v1381_v40 = vsel %vm1380_vm3, %v1370_v53, %v1374_v35  ;;  %v1354_v43 = vpop.f32.mrf.mxu3  ;;  %v1377_v50 = vrot.slane %v1374_v35, 2  ;;  %v1387_v49 = vpack.c.bf16 %v1360_v5, %v1360_v5 }
 0x3b2   :  { %v1384_v17 = vpack.c.bf16 %v1381_v40, %v1381_v40 }
 0x3b3   :  { %v1382_v63 = vsel %vm1380_vm3, %v1372_v54, %v1376_v32  ;;  %v1383_v13 = vsel %vm1380_vm3, %v1374_v35, %v1377_v50 }
 0x3b4   :  { %1656 = vmatmul.bf16.vlgmr.msra.gmra.mxu3 %v1384_v17  ;;  %v1385_v22 = vpack.c.bf16 %v1382_v63, %v1382_v63  ;;  %v1386_v12 = vpack.c.bf16 %v1383_v13, %v1383_v13 }
 0x3b6   :  { %1669 = vmatmul.bf16.vlgmr.msra.gmra.mxu2 %v1385_v22 }
 0x3c4   :  { %1682 = vmatmul.bf16.vlgmr.msrb.gmra.mxu3 %v1386_v12 }
 0x3c6   :  { %1695 = vmatmul.bf16.vlgmr.msrb.gmra.mxu2 %v1387_v49 }
 0x437   :  { %v1657_v51 = vpop.f32.mrf.mxu3 }
 0x438   :  { %v1658_v58 = vadd.f32 %v2304_v27, %v1657_v51 }
 0x439   :  { %v1670_v16 = vpop.f32.mrf.mxu2 }
 0x43a   :  { %v1671_v36 = vadd.f32 %v1670_v16, %v1658_v58 }
 0x43f   :  { %v1659_v47 = vpop.f32.mrf.mxu3 }
 0x441   :  { %v1672_v3 = vpop.f32.mrf.mxu2 }
 0x447   :  { %v1683_v33 = vpop.f32.mrf.mxu3 }
 0x448   :  { %v1684_v24 = vadd.f32 %v1683_v33, %v1671_v36 }
 0x449   :  { %v1696_v57 = vpop.f32.mrf.mxu2 }
 0x44a   :  { %v1697_v7 = vadd.f32 %v1696_v57, %v1684_v24 }
 0x44c   :  { %1700 = vst [vmem:[%s3094_s7] sm:$0x3] %v1697_v7 }
 0x44f   :  { %v1685_v45 = vpop.f32.mrf.mxu3 }
 0x451   :  { %v1698_v29 = vpop.f32.mrf.mxu2 }

</bundles_post_ra>
